<compile_context>
chip_gen: v7x
topology: tpu7x:2x2x1
jax: 0.10.0
libtpu: 0.0.40
codegen_flags: <defaults>
</compile_context>

<pallas_src>
import functools

import numpy as np

import jax
import jax.numpy as jnp
from jax.experimental import pallas as pl
from jax.experimental.pallas import tpu as pltpu


def _round_up(x, m):
    return ((x + m - 1) // m) * m


def _vmem_capacity_bytes():
    """Generation-aware VMEM size (128 MiB v5e/v6e, 64 MiB v7x); safe fallback."""
    try:
        cap = int(pltpu.get_tpu_info().vmem_capacity_bytes)
        if cap > 0:
            return cap
    except Exception:
        pass
    return 64 * 1024 * 1024  # conservative (v7x-sized)


def _mlp_kernel(x_ref, wgu_ref, wd_ref, o_ref, acc_ref, *, n_i_chunks, resident):
    """One (token tile, I-chunk) step of the fused SwiGLU MLP.

    x_ref  : (tm, H)                 input token tile (already in MXU feed dtype)
    wgu_ref: (KI or 1, H, 2*ti)      fused [gate | up] weights (pre-transposed)
    wd_ref : (KI or 1, ti, H)        down-projection weights (pre-transposed)
    o_ref  : (tm, H)                 output token tile (written on last I-chunk)
    acc_ref: (tm, H) f32             VMEM accumulator, resident across the I axis
    """
    k = pl.program_id(1)

    # Weight chunk for this I-step.  In resident mode the full weight stack
    # lives in VMEM (constant block index -> fetched from HBM exactly once per
    # kernel call) and we dynamically slice chunk k; in chunked mode the
    # pipeline streams chunk k and the leading block axis is a single entry.
    ci = k if resident else 0
    wgu = wgu_ref[ci]                       # (H, 2*ti)
    wd = wd_ref[ci]                         # (ti, H)
    ti = wgu.shape[-1] // 2

    x = x_ref[...]                          # no per-chunk cast: done in wrapper

    # Single MXU stream computes both gate and up for this I-chunk;
    # accumulate in f32 (preferred_element_type).
    gu = jnp.dot(x, wgu, preferred_element_type=jnp.float32)   # (tm, 2*ti)
    g = gu[:, :ti]                          # lane-aligned: ti % 128 == 0
    u = gu[:, ti:]

    # SiluAndMul in f32 (VPU + EUP); downcast only for the MXU feed below.
    h = (g * jax.nn.sigmoid(g)) * u

    part = jnp.dot(h.astype(wd.dtype), wd, preferred_element_type=jnp.float32)

    if n_i_chunks == 1:
        o_ref[...] = part.astype(o_ref.dtype)
    else:
        @pl.when(k == 0)
        def _():
            acc_ref[...] = part             # init-by-write (no zeros pass)

        @pl.when(jnp.logical_and(k > 0, k < n_i_chunks - 1))
        def _():
            acc_ref[...] += part

        @pl.when(k == n_i_chunks - 1)
        def _():
            # Fused final accumulate + cast: saves one (tm, H) f32 RMW.
            o_ref[...] = (acc_ref[...] + part).astype(o_ref.dtype)


def prepare_pixtral_mlp_weights(w_gate_up, w_down, *, tk_i=1024, dtype=jnp.bfloat16):
    """Run ONCE at weight-load time (not in the per-call forward).

    w_gate_up: (2*I, H) torch nn.Linear layout (gate rows, then up rows).
    w_down   : (H, I)   torch nn.Linear layout.

    Returns:
      wgu_tiled: (KI, H, 2*ti)  chunk k = [gate_k | up_k], already transposed
      wd_tiled : (KI, ti, H)
    """
    two_I, H = w_gate_up.shape
    I = two_I // 2
    Hd, Id = w_down.shape
    assert Hd == H and Id == I, (w_gate_up.shape, w_down.shape)

    ti = min(tk_i, I)
    assert I % ti == 0, f"intermediate_size {I} must be divisible by tk_i {ti}"
    assert H % 128 == 0, f"hidden_size {H} must be a multiple of 128"
    assert ti % 128 == 0, f"I-chunk {ti} must be a multiple of 128 (lane tile)"
    KI = I // ti
    if dtype is None:
        dtype = w_gate_up.dtype

    wg = jnp.transpose(w_gate_up[:I, :])      # (H, I)
    wu = jnp.transpose(w_gate_up[I:, :])      # (H, I)
    wd = jnp.transpose(w_down)                # (I, H)

    wg_t = jnp.transpose(wg.reshape(H, KI, ti), (1, 0, 2))   # (KI, H, ti)
    wu_t = jnp.transpose(wu.reshape(H, KI, ti), (1, 0, 2))   # (KI, H, ti)
    wgu_tiled = jnp.concatenate([wg_t, wu_t], axis=-1)       # (KI, H, 2*ti)
    wd_tiled = wd.reshape(KI, ti, H)                         # (KI, ti, H)
    return wgu_tiled.astype(dtype), wd_tiled.astype(dtype)


def pixtral_hf_mlp(x, wgu_tiled, wd_tiled, *, tm=512, out_dtype=None,
                   weights_resident=None, vmem_limit_bytes=None):
    """x: (T, H).  wgu_tiled: (KI, H, 2*ti).  wd_tiled: (KI, ti, H)."""
    T, H = x.shape
    KI, Hw, two_ti = wgu_tiled.shape
    assert Hw == H, (wgu_tiled.shape, x.shape)
    ti = two_ti // 2
    if out_dtype is None:
        out_dtype = x.dtype

    # Feed the MXU in the weight dtype (bf16 by default): one cast at the
    # boundary halves x DMA and avoids re-casting x inside every I-chunk.
    x_feed = x.astype(wgu_tiled.dtype)

    # Token tile: big for MXU utilization / weight reuse, capped for small T,
    # multiple of 8 (sublane).  Rows beyond T are padded blocks (never stored).
    tm_eff = max(8, min(tm, _round_up(T, 8)))
    n_token_tiles = pl.cdiv(T, tm_eff)
    # TODO(synk): on v7x (2 TensorCores) cap tm_eff so the parallel token axis
    #             has >=2 tiles for small T; off by default since it doubles
    #             weight re-streaming on single-core v5e/v6e.

    vmem_cap = _vmem_capacity_bytes()
    if vmem_limit_bytes is None:
        vmem_limit_bytes = int(vmem_cap * 0.85)

    weight_bytes = (wgu_tiled.size * wgu_tiled.dtype.itemsize
                    + wd_tiled.size * wd_tiled.dtype.itemsize)
    act_bytes = (2 * tm_eff * H * (x_feed.dtype.itemsize
                                   + np.dtype(out_dtype).itemsize)
                 + tm_eff * H * 4            # f32 accumulator
                 + tm_eff * two_ti * 4)      # gu temp
    if weights_resident is None:
        # Resident only if the whole weight stack (conservatively assume the
        # pipeline keeps two buffers) plus activation tiles fits comfortably.
        weights_resident = (2 * weight_bytes + act_bytes) <= int(0.6 * vmem_cap)

    if weights_resident:
        # Constant block index -> weights DMA'd from HBM exactly once.
        wgu_spec = pl.BlockSpec((KI, H, two_ti), lambda i, k: (0, 0, 0))
        wd_spec = pl.BlockSpec((KI, ti, H), lambda i, k: (0, 0, 0))
    else:
        # Streamed one I-chunk at a time (re-fetched per token tile).
        wgu_spec = pl.BlockSpec((1, H, two_ti), lambda i, k: (k, 0, 0))
        wd_spec = pl.BlockSpec((1, ti, H), lambda i, k: (k, 0, 0))

    kernel = functools.partial(_mlp_kernel, n_i_chunks=KI,
                               resident=bool(weights_resident))

    return pl.pallas_call(
        kernel,
        out_shape=jax.ShapeDtypeStruct((T, H), out_dtype),
        grid_spec=pltpu.PrefetchScalarGridSpec(
            num_scalar_prefetch=0,
            grid=(n_token_tiles, KI),
            in_specs=[
                pl.BlockSpec((tm_eff, H), lambda i, k: (i, 0)),   # x tile
                wgu_spec,                                          # gate|up
                wd_spec,                                           # down
            ],
            out_specs=pl.BlockSpec((tm_eff, H), lambda i, k: (i, 0)),
            scratch_shapes=[pltpu.VMEM((tm_eff, H), jnp.float32)],
        ),
        compiler_params=pltpu.CompilerParams(
            dimension_semantics=("parallel", "arbitrary"),
            vmem_limit_bytes=vmem_limit_bytes,
        ),
    )(x_feed, wgu_tiled, wd_tiled)


def _reference(x, w_gate_up, w_down):
    I = w_gate_up.shape[0] // 2
    gate_up = x @ w_gate_up.T
    g, u = gate_up[:, :I], gate_up[:, I:]
    h = (g * jax.nn.sigmoid(g)) * u
    return h @ w_down.T


if __name__ == "__main__":
    # Small PixtralVisionConfig-like sizes (hidden=256, intermediate=512),
    # chosen so both grid axes can have >1 step and dims stay 128-aligned.
    T, H, I = 64, 256, 512

    key = jax.random.PRNGKey(0)
    kx, kg, kd = jax.random.split(key, 3)

    x = jax.random.normal(kx, (T, H), dtype=jnp.float32)
    # PyTorch nn.Linear weight layouts: (out_features, in_features).
    w_gate_up = jax.random.normal(kg, (2 * I, H), dtype=jnp.float32) * 0.02
    w_down = jax.random.normal(kd, (H, I), dtype=jnp.float32) * 0.02

    ref = _reference(x, w_gate_up, w_down)

    # f32-weight path, forced CHUNKED streaming (2 token tiles x 2 I-chunks):
    # exact check against the f32 reference.
    wgu_f32, wd_f32 = prepare_pixtral_mlp_weights(
        w_gate_up, w_down, tk_i=256, dtype=jnp.float32)
    out = jax.block_until_ready(
        pixtral_hf_mlp(x, wgu_f32, wd_f32, tm=32, weights_resident=False))
    assert out.shape == (T, H), out.shape
    assert jnp.allclose(out, ref, atol=1e-4, rtol=1e-4), \
        float(jnp.max(jnp.abs(out - ref)))

    # bf16-weight path (default dtype), auto weights-RESIDENT mode (weights are
    # tiny here so they stay in VMEM); silu math f32, accumulation f32 —
    # loose tolerance vs the f32 reference.
    wgu_b16, wd_b16 = prepare_pixtral_mlp_weights(w_gate_up, w_down, tk_i=256)
    out_b16 = jax.block_until_ready(pixtral_hf_mlp(x, wgu_b16, wd_b16))
    assert out_b16.shape == (T, H), out_b16.shape
    assert jnp.allclose(out_b16, ref, atol=2e-2, rtol=1e-1), \
        float(jnp.max(jnp.abs(out_b16 - ref)))

    print("KERNEL_OK")
</pallas_src>

<mosaic_0001>
module attributes {stable_mosaic.version = 11 : i64} {
  func.func @_mlp_kernel(%arg0: i32, %arg1: i32, %arg2: memref<32x256xf32, #tpu.memory_space<vmem>>, %arg3: memref<1x256x512xf32, #tpu.memory_space<vmem>>, %arg4: memref<1x256x256xf32, #tpu.memory_space<vmem>>, %arg5: memref<32x256xf32, #tpu.memory_space<vmem>>, %arg6: memref<32x256xf32, #tpu.memory_space<vmem>>) attributes {dimension_semantics = [#tpu.dimension_semantics<parallel>, #tpu.dimension_semantics<arbitrary>], iteration_bounds = array<i64: 2, 2>, scalar_prefetch = 0 : i64, scratch_operands = 1 : i64, tpu.core_type = #tpu.core_type<tc>, window_params = [{transform_indices = @transform_0, window_bounds = array<i64: 32, 256>}, {transform_indices = @transform_1, window_bounds = array<i64: 1, 256, 512>}, {transform_indices = @transform_2, window_bounds = array<i64: 1, 256, 256>}, {transform_indices = @transform_3, window_bounds = array<i64: 32, 256>}]} {
    %c0 = arith.constant 0 : index
    %c0_0 = arith.constant 0 : index
    %c0_1 = arith.constant 0 : index
    %0 = vector.load %arg3[%c0, %c0_0, %c0_1] : memref<1x256x512xf32, #tpu.memory_space<vmem>>, vector<1x256x512xf32>
    %1 = vector.shape_cast %0 : vector<1x256x512xf32> to vector<256x512xf32>
    %c0_2 = arith.constant 0 : index
    %c0_3 = arith.constant 0 : index
    %c0_4 = arith.constant 0 : index
    %2 = vector.load %arg4[%c0_2, %c0_3, %c0_4] : memref<1x256x256xf32, #tpu.memory_space<vmem>>, vector<1x256x256xf32>
    %3 = vector.shape_cast %2 : vector<1x256x256xf32> to vector<256x256xf32>
    %c0_5 = arith.constant 0 : index
    %c0_6 = arith.constant 0 : index
    %4 = vector.load %arg2[%c0_5, %c0_6] : memref<32x256xf32, #tpu.memory_space<vmem>>, vector<32x256xf32>
    %cst = arith.constant dense<0.000000e+00> : vector<32x512xf32>
    %5 = tpu.matmul %4, %1, %cst {dimension_numbers = #tpu.dot_dimension_numbers<[1], [0], [0], [1], [0, 0, 1, 1], [], []>} : vector<32x256xf32>, vector<256x512xf32>, vector<32x512xf32> -> vector<32x512xf32>
    %6 = vector.extract_strided_slice %5 {offsets = [0, 0], sizes = [32, 256], strides = [1, 1]} : vector<32x512xf32> to vector<32x256xf32>
    %7 = vector.extract_strided_slice %5 {offsets = [0, 256], sizes = [32, 256], strides = [1, 1]} : vector<32x512xf32> to vector<32x256xf32>
    %8 = arith.negf %6 : vector<32x256xf32>
    %9 = math.exp %8 : vector<32x256xf32>
    %cst_7 = arith.constant 1.000000e+00 : f32
    %10 = vector.broadcast %cst_7 : f32 to vector<32x256xf32>
    %11 = arith.addf %10, %9 : vector<32x256xf32>
    %12 = arith.divf %10, %11 : vector<32x256xf32>
    %13 = arith.mulf %6, %12 : vector<32x256xf32>
    %14 = arith.mulf %13, %7 : vector<32x256xf32>
    %cst_8 = arith.constant dense<0.000000e+00> : vector<32x256xf32>
    %15 = tpu.matmul %14, %3, %cst_8 {dimension_numbers = #tpu.dot_dimension_numbers<[1], [0], [0], [1], [0, 0, 1, 1], [], []>} : vector<32x256xf32>, vector<256x256xf32>, vector<32x256xf32> -> vector<32x256xf32>
    %c0_i32 = arith.constant 0 : i32
    %16 = arith.cmpi eq, %arg1, %c0_i32 : i32
    %17 = arith.extui %16 : i1 to i32
    %c0_i32_9 = arith.constant 0 : i32
    %18 = arith.cmpi ne, %17, %c0_i32_9 : i32
    scf.if %18 {
      %c0_14 = arith.constant 0 : index
      %c0_15 = arith.constant 0 : index
      %27 = vector.load %arg6[%c0_14, %c0_15] : memref<32x256xf32, #tpu.memory_space<vmem>>, vector<32x256xf32>
      tpu.vector_store %arg6[%c0_14, %c0_15], %15 {strides = array<i32>} : memref<32x256xf32, #tpu.memory_space<vmem>>, vector<32x256xf32>,
    } else {
    }
    %c0_i32_10 = arith.constant 0 : i32
    %19 = arith.cmpi sgt, %arg1, %c0_i32_10 : i32
    %c1_i32 = arith.constant 1 : i32
    %20 = arith.cmpi slt, %arg1, %c1_i32 : i32
    %21 = arith.andi %19, %20 : i1
    %22 = arith.extui %21 : i1 to i32
    %c0_i32_11 = arith.constant 0 : i32
    %23 = arith.cmpi ne, %22, %c0_i32_11 : i32
    scf.if %23 {
      %c0_14 = arith.constant 0 : index
      %c0_15 = arith.constant 0 : index
      %27 = vector.load %arg6[%c0_14, %c0_15] : memref<32x256xf32, #tpu.memory_space<vmem>>, vector<32x256xf32>
      %28 = arith.addf %27, %15 : vector<32x256xf32>
      %c0_16 = arith.constant 0 : index
      %c0_17 = arith.constant 0 : index
      %29 = vector.load %arg6[%c0_16, %c0_17] : memref<32x256xf32, #tpu.memory_space<vmem>>, vector<32x256xf32>
      tpu.vector_store %arg6[%c0_16, %c0_17], %28 {strides = array<i32>} : memref<32x256xf32, #tpu.memory_space<vmem>>, vector<32x256xf32>,
    } else {
    }
    %c1_i32_12 = arith.constant 1 : i32
    %24 = arith.cmpi eq, %arg1, %c1_i32_12 : i32
    %25 = arith.extui %24 : i1 to i32
    %c0_i32_13 = arith.constant 0 : i32
    %26 = arith.cmpi ne, %25, %c0_i32_13 : i32
    scf.if %26 {
      %c0_14 = arith.constant 0 : index
      %c0_15 = arith.constant 0 : index
      %27 = vector.load %arg6[%c0_14, %c0_15] : memref<32x256xf32, #tpu.memory_space<vmem>>, vector<32x256xf32>
      %28 = arith.addf %27, %15 : vector<32x256xf32>
      %c0_16 = arith.constant 0 : index
      %c0_17 = arith.constant 0 : index
      %29 = vector.load %arg5[%c0_16, %c0_17] : memref<32x256xf32, #tpu.memory_space<vmem>>, vector<32x256xf32>
      tpu.vector_store %arg5[%c0_16, %c0_17], %28 {strides = array<i32>} : memref<32x256xf32, #tpu.memory_space<vmem>>, vector<32x256xf32>,
    } else {
    }
    return
  }
  func.func @transform_0(%arg0: i32, %arg1: i32) -> (i32, i32) {
    %c0_i32 = arith.constant 0 : i32
    %c0_i32_0 = arith.constant 0 : i32
    return %arg0, %c0_i32 : i32, i32
  }
  func.func @transform_1(%arg0: i32, %arg1: i32) -> (i32, i32, i32) {
    %c0_i32 = arith.constant 0 : i32
    %c0_i32_0 = arith.constant 0 : i32
    %c0_i32_1 = arith.constant 0 : i32
    return %arg1, %c0_i32, %c0_i32_0 : i32, i32, i32
  }
  func.func @transform_2(%arg0: i32, %arg1: i32) -> (i32, i32, i32) {
    %c0_i32 = arith.constant 0 : i32
    %c0_i32_0 = arith.constant 0 : i32
    %c0_i32_1 = arith.constant 0 : i32
    return %arg1, %c0_i32, %c0_i32_0 : i32, i32, i32
  }
  func.func @transform_3(%arg0: i32, %arg1: i32) -> (i32, i32) {
    %c0_i32 = arith.constant 0 : i32
    %c0_i32_0 = arith.constant 0 : i32
    return %arg0, %c0_i32 : i32, i32
  }
}

</mosaic_0001>

<bundles_post_ra>
// kernel: tpu_custom_call.1
= control target key start
LH: loop header
LB: loop body
LE: loop exit
PB: predicated region body
PF: predicated region fallthrough
CT: control target
= control target key end

     0   :  { %s2266_s0 = inlined_call_operand.hbm [shape: f32[64,256], index: 0, kind: input, shape index: {}]   ;;  %s2267_s1 = inlined_call_operand.hbm [shape: f32[2,256,512], index: 1, kind: input, shape index: {}]   ;;  %s2268_s2 = inlined_call_operand.hbm [shape: f32[2,256,256], index: 2, kind: input, shape index: {}]   ;;  %s2269_s3 = inlined_call_operand.hbm [shape: f32[64,256], index: 3, kind: output, shape index: {}]  }
   0x1   :  { %2283 = sst [smem:[#allocation19_spill]] %s2267_s1 }
   0x2   :  { %2284 = sst [smem:[#allocation20_spill]] %s2269_s3 }
   0x3   :  { %8 = vsyncpa [#allocation4], 0 }
   0x4   :  { %10 = vsyncpa [#allocation4 + $0x1], 0 }
   0x5   :  { %11 = vsyncpa [#allocation7], 0 }
   0x6   :  { %13 = vsyncpa [#allocation7 + $0x1], 0 }
   0x7   :  { %14 = vsyncpa [#allocation5], 0 }
   0x8   :  { %16 = vsyncpa [#allocation5 + $0x1], 0  ;;  %s1687_s12 = smov 0   ;;  %s1689_s13 = smov 0  }
   0x9   :  { %s1691_s14 = smov 0   ;;  %s1693_s15 = smov 0  }
   0xa   :  { %s1695_s16 = smov 0   ;;  %s1697_s17 = smov 0  }
   0xb   :  { %s1699_s18 = smov 0   ;;  %s1701_s19 = smov 0  }
   0xc   :  { %s1703_s20 = smov 0   ;;  %s1705_s21 = smov 0  }
   0xd   :  { %s1707_s22 = smov 0  }
   0xe LB: > { %2285 = sst [smem:[#allocation13_spill]] %s1623_s14  ;;  %s1741_s23 = sadd.s32 4294967295, %s1655_s22   ;;  %s1655_s22 = sphi %s1707_s22, %s22_s22   ;;  %s1651_s21 = sphi %s1705_s21, %s2326_s21   ;;  %s1647_s20 = sphi %s1703_s20, %s2325_s20   ;;  %s1643_s19 = sphi %s1701_s19, %s2316_s19   ;;  %s1639_s18 = sphi %s1699_s18, %s2324_s18   ;;  %s1635_s17 = sphi %s1697_s17, %s2323_s17   ;;  %s1631_s16 = sphi %s1695_s16, %s2322_s16   ;;  %s1627_s15 = sphi %s1693_s15, %s2321_s15   ;;  %s1623_s14 = sphi %s1691_s14, %s2315_s14   ;;  %s1619_s13 = sphi %s1689_s13, %s2320_s13   ;;  %s1615_s12 = sphi %s1687_s12, %s2319_s12  }
   0xf   : > { %2286 = sst [smem:[#allocation14_spill]] %s1627_s15  ;;  %s31_s24 = sadd.s32 1, %s1647_s20 }
  0x10   : > { %2287 = sst [smem:[#allocation15_spill]] %s1651_s21  ;;  %p1744_p0 = scmp.ge.s32.totalorder %s31_s24, 2 }
  0x11   : > { %p2273_p1 = scmp.eq.s32.totalorder %s1655_s22, 0  ;;  %p2272_p2 = scmp.eq.s32.totalorder %s1741_s23, 0 }
  0x12   : > { %s67_s26 = sadd.s32 1, %s1623_s14  ;;  %s2328_s24 = smov (%p1744_p0, %s31_s24), 0 }
  0x13   : > { %2289 = sst [smem:[#allocation16_spill]] %s2328_s24  ;;  %p74_p3 = scmp.ne.s32.totalorder %s1623_s14, %s1619_s13 }
  0x14   : > { %p80_p4 = scmp.ne.s32.totalorder %s1619_s13, %s1615_s12  ;;  %s64_s27 = ssub.s32 %s1647_s20, %s2328_s24 }
  0x15   : > { %p65_p5 = scmp.eq.s32.totalorder %s64_s27, 0  ;;  %p76_p6 = por %p74_p3, %p2273_p1 }
  0x16   : > { %p1764_p7 = por %p80_p4, %p2272_p2  ;;  %p2271_p8 = scmp.lt.s32.totalorder %s1655_s22, 4 }
  0x17   : > { %s1770_s29 = scalar_select %p65_p5, %s1623_s14, %s67_s26  }
  0x18   : > { %s2290_s28 = scalar_select %p1764_p7, 1, 0 }
  0x19   : > { %2291 = sst [smem:[#allocation17_spill]] %s1770_s29  ;;  %s178_s30 = sand.u32 1, %s1655_s22  }
  0x1a   : > { %s180_s4 = sand.u32 1, %s1623_s14   ;;  %s1061_s6 = sshll.u32 %s1647_s20, 14 }
  0x1b   : > { %s1032_s5 = sshll.u32 %s180_s4, 10  ;;  %s2292_s1 = sld [smem:[#allocation19_spill]] }
  0x1c   : > { %s182_s10 = scalar_lea.vmem [#allocation6], %s1032_s5  ;;  %p1784_p9 = pnand %p2271_p8, %p76_p6 }
  0x1d   : > { %s189_s11 = sshll.u32 %s182_s10, 4  ;;  %s1788_s26 = sshll.u32 %s180_s4, 9  ;;  %s1780_s11 = int_to_ptr.vmem [resolvable:$true] %s189_s11 }
  0x1e   : > { %s1790_s27 = scalar_lea.sflag [#allocation7], %s178_s30  ;;  %p2280_p11 = pneg %p1784_p9 }
  0x21   : > { %s1778_s9 = scalar_lea.hbm %s2292_s1, %s1061_s6  ;;  %s1444_s8 = scalar_lea.hbm %s2292_s1, 32768 }
  0x22   : > { %s1439_s6 = scalar_lea.hbm %s1778_s9, 16384  ;;  %p1445_p3 = scmp.lt.u32.totalorder %s1778_s9, %s2292_s1 }
  0x23   : > { %p1440_p10 = scmp.ne.s32.totalorder %s1778_s9, %s1439_s6  ;;  %p1446_p4 = scmp.lt.u32.totalorder %s1444_s8, %s1439_s6 }
  0x24   : > { %p1448_p6 = scmp.lt.u32.totalorder %s1439_s6, %s1778_s9 }
  0x25   : > { %p1442_p12 = pnand %p2280_p11, %p1440_p10  ;;  %p1447_p5 = por %p1446_p4, %p1445_p3 }
  0x27   : > { %p1443_p13 = pneg %p1442_p12  ;;  %p1449_p8 = por %p1448_p6, %p1447_p5 }
  0x29   : > { %p1450_p2 = pnand %p1449_p8, %p1443_p13 }
  0x2b   : > { %1453 = shalt.err (!%p1450_p2)
}
  0x2c   : > { %s1454_s30 = scalar_lea.vmem %s1780_s11, 16384  ;;  %s1657_s4 = smov [#allocation6]  }
  0x2d   : > { %p1455_p10 = scmp.ne.s32.totalorder %s1780_s11, %s1454_s30  ;;  %s1459_s5 = sshll.u32 %s1657_s4, 4  ;;  %s1460_s5 = int_to_ptr.vmem [resolvable:$false] %s1459_s5 }
  0x2e   : > { %s1461_s24 = scalar_lea.vmem %s1460_s5, 32768  ;;  %p1462_p7 = scmp.lt.s32.totalorder %s1780_s11, %s1460_s5 }
  0x2f   : > { %p1457_p12 = pnand %p1455_p10, %p2280_p11  ;;  %p1463_p3 = scmp.lt.s32.totalorder %s1461_s24, %s1454_s30 }
  0x31   : > { %p1458_p1 = pneg %p1457_p12  ;;  %p1464_p4 = por %p1463_p3, %p1462_p7 }
  0x33   : > { %p1465_p5 = pnand %p1464_p4, %p1458_p1 }
  0x35   : > { %1468 = shalt.err (!%p1465_p5)
}
  0x36   : > { %s1658_s6 = smov 512   ;;  %s1659_s7 = smov 32  }
  0x37   : > { %1303 = dma.hbm_to_vmem [thread:$0]  (!%p1784_p9), %s1778_s9, 16384, %s1780_s11, %s1790_s27, %s1658_s6, %s1658_s6, %s1659_s7  }
  0x38   : > { %p1038_p1 = scmp.ge.s32.totalorder %s1655_s22, 1  ;;  %s203_s8 = scalar_lea.vmem [#allocation8], %s1788_s26 }
  0x39   : > { %s1820_s10 = sshll.u32 %s203_s8, 4  ;;  %p218_p2 = scmp.lt.s32.totalorder %s1655_s22, 5  ;;  %s1922_s10 = int_to_ptr.vmem [resolvable:$true] %s1820_s10 }
  0x3a   : > { %s1025_s4 = sadd.s32 4294967294, %s1655_s22   ;;  %s34_s5 = sadd.s32 1, %s1651_s21 }
  0x3b   : > { %p1823_p7 = pnand %p1038_p1, %p218_p2  ;;  %s41_s24 = sadd.s32 1, %s1635_s17 }
  0x3c   : > { %s2330_s5 = smov (!%p1744_p0, %s34_s5), %s1651_s21  ;;  %p48_p8 = scmp.ne.s32.totalorder %s1635_s17, %s1631_s16 }
  0x3d   : > { %s2294_s30 = scalar_select %p1823_p7, 1, 0 }
  0x3e   : > { %p54_p13 = scmp.ne.s32.totalorder %s1631_s16, %s1627_s15  ;;  %p36_p6 = scmp.ge.s32.totalorder %s2330_s5, 2 }
  0x3f   : > { %p130_p10 = scmp.eq.s32.totalorder %s1741_s23, 3  ;;  %p2295_p12 = scmp.eq.s32.totalorder %s1655_s22, 0 }
  0x40   : > { %p2297_p4 = scmp.eq.s32.totalorder %s1741_s23, 0  ;;  %s2332_s5 = smov (%p36_p6, %s2330_s5), 0 }
  0x41   : > { %p1840_p3 = por %p2295_p12, %p48_p8  ;;  %2299 = sst [smem:[#allocation18_spill]] %s2332_s5 }
  0x42   : > { %p1846_p5 = por %p2297_p4, %p54_p13  ;;  %p1852_p0 = por %p130_p10, %p48_p8 }
  0x43   : > { %p136_p1 = scmp.eq.s32.totalorder %s1025_s4, 3  ;;  %s38_s26 = ssub.s32 %s1651_s21, %s2332_s5 }
  0x44   : > { %s2298_s11 = scalar_select %p1846_p5, 1, 0 }
  0x45   : > { %s2300_s25 = scalar_select %p1852_p0, 1, 0 }
  0x46   : > { %s156_s6 = sand.u32 1, %s1635_s17   ;;  %p39_p2 = scmp.eq.s32.totalorder %s38_s26, 0 }
  0x47   : > { %p1859_p12 = por %p136_p1, %p54_p13  ;;  %s1028_s8 = sshll.u32 %s156_s6, 6 }
  0x48   : > { %s1864_s1 = scalar_select %p39_p2, %s1635_s17, %s41_s24  }
  0x49   : > { %s2301_s7 = scalar_select %p1859_p12, 1, 0 }
  0x4a   : > { %s1060_s29 = sshll.u32 %s1651_s21, 10  ;;  %s160_s4 = scalar_lea.vmem [#allocation3], %s1028_s8 }
  0x4b   : > { %s1870_s3 = scalar_lea.hbm %s2266_s0, %s1060_s29  ;;  %s168_s5 = sshll.u32 %s160_s4, 4  ;;  %s1872_s5 = int_to_ptr.vmem [resolvable:$true] %s168_s5 }
  0x4c   : > { %p2302_p8 = scmp.lt.s32.totalorder %s1655_s22, 4  ;;  %s1062_s24 = sshll.u32 %s1647_s20, 13 }
  0x4d   : > { %s1883_s14 = scalar_lea.sflag [#allocation4], %s156_s6  ;;  %s1469_s15 = scalar_lea.hbm %s1870_s3, 1024 }
  0x4e   : > { %p1878_p13 = pnand %p2302_p8, %p1840_p3  ;;  %p1470_p6 = scmp.ne.s32.totalorder %s1870_s3, %s1469_s15 }
  0x4f   : > { %s1474_s8 = scalar_lea.hbm %s2266_s0, 2048  ;;  %p1475_p3 = scmp.lt.u32.totalorder %s1870_s3, %s2266_s0 }
  0x50   : > { %p1471_p10 = pneg %p1878_p13  ;;  %p1476_p2 = scmp.lt.u32.totalorder %s1474_s8, %s1469_s15 }
  0x51   : > { %p1478_p11 = scmp.lt.u32.totalorder %s1469_s15, %s1870_s3 }
  0x52   : > { %p1472_p4 = pnand %p1471_p10, %p1470_p6  ;;  %p1477_p8 = por %p1476_p2, %p1475_p3 }
  0x54   : > { %p1473_p1 = pneg %p1472_p4  ;;  %p1479_p12 = por %p1478_p11, %p1477_p8 }
  0x56   : > { %p1480_p0 = pnand %p1479_p12, %p1473_p1 }
  0x58   : > { %1483 = shalt.err (!%p1480_p0)
}
  0x59   : > { %s1484_s6 = scalar_lea.vmem %s1872_s5, 1024  ;;  %s1660_s29 = smov [#allocation3]  }
  0x5a   : > { %p1485_p6 = scmp.ne.s32.totalorder %s1872_s5, %s1484_s6  ;;  %s1489_s9 = sshll.u32 %s1660_s29, 4  ;;  %s1490_s9 = int_to_ptr.vmem [resolvable:$false] %s1489_s9 }
  0x5b   : > { %s1491_s21 = scalar_lea.vmem %s1490_s9, 2048  ;;  %p1492_p7 = scmp.lt.s32.totalorder %s1872_s5, %s1490_s9 }
  0x5c   : > { %p1487_p4 = pnand %p1485_p6, %p1471_p10  ;;  %p1493_p3 = scmp.lt.s32.totalorder %s1491_s21, %s1484_s6 }
  0x5e   : > { %p1488_p5 = pneg %p1487_p4  ;;  %p1494_p2 = por %p1493_p3, %p1492_p7 }
  0x60   : > { %p1495_p11 = pnand %p1494_p2, %p1488_p5 }
  0x62   : > { %1498 = shalt.err (!%p1495_p11)
}
  0x63   : > { %s1661_s15 = smov 256   ;;  %s1662_s8 = smov 16  }
  0x64   : > { %1300 = dma.hbm_to_vmem [thread:$0]  (!%p1878_p13), %s1870_s3, 1024, %s1872_s5, %s1883_s14, %s1661_s15, %s1661_s15, %s1662_s8  }
  0x65   : > { %s1919_s29 = scalar_lea.hbm %s2268_s2, %s1062_s24  ;;  %p2304_p5 = pneg %p1784_p9 }
  0x66   : > { %s1499_s9 = scalar_lea.hbm %s1919_s29, 8192  ;;  %s1504_s5 = scalar_lea.hbm %s2268_s2, 16384 }
  0x67   : > { %p1500_p7 = scmp.ne.s32.totalorder %s1919_s29, %s1499_s9  ;;  %p1505_p13 = scmp.lt.u32.totalorder %s1919_s29, %s2268_s2 }
  0x68   : > { %p1506_p10 = scmp.lt.u32.totalorder %s1504_s5, %s1499_s9  ;;  %p1508_p8 = scmp.lt.u32.totalorder %s1499_s9, %s1919_s29 }
  0x69   : > { %p1502_p0 = pnand %p1500_p7, %p2304_p5 }
  0x6a   : > { %p1507_p1 = por %p1506_p10, %p1505_p13 }
  0x6b   : > { %p1503_p12 = pneg %p1502_p0 }
  0x6c   : > { %p1509_p6 = por %p1508_p8, %p1507_p1 }
  0x6e   : > { %p1510_p4 = pnand %p1509_p6, %p1503_p12 }
  0x70   : > { %1513 = shalt.err (!%p1510_p4)
}
  0x71   : > { %s1514_s24 = scalar_lea.vmem %s1922_s10, 8192  ;;  %p2305_p2 = pmov %p2304_p5 }
  0x72   : > { %p1515_p3 = scmp.ne.s32.totalorder %s1922_s10, %s1514_s24  ;;  %s1663_s4 = smov [#allocation8]  }
  0x73   : > { %s1519_s6 = sshll.u32 %s1663_s4, 4  ;;  %s1520_s6 = int_to_ptr.vmem [resolvable:$false] %s1519_s6 }
  0x74   : > { %p1517_p11 = pnand %p1515_p3, %p2305_p2  ;;  %s1521_s26 = scalar_lea.vmem %s1520_s6, 16384 }
  0x75   : > { %p1522_p5 = scmp.lt.s32.totalorder %s1922_s10, %s1520_s6  ;;  %p1523_p0 = scmp.lt.s32.totalorder %s1521_s26, %s1514_s24 }
  0x76   : > { %p1518_p7 = pneg %p1517_p11 }
  0x77   : > { %p1524_p13 = por %p1523_p0, %p1522_p5 }
  0x79   : > { %p1525_p10 = pnand %p1524_p13, %p1518_p7 }
  0x7b   : > { %1528 = shalt.err (!%p1525_p10)
}
  0x7c   : > { %1306 = dma.hbm_to_vmem [thread:$0]  (!%p1784_p9), %s1919_s29, 8192, %s1922_s10, %s1790_s27, %s1661_s15, %s1661_s15, %s1662_s8  }
  0x7d   : > { %p2306_p12 = scmp.ne.s32.totalorder %s2294_s30, 0 }
  0x7e   : > { %s1954_s9 = sand.u32 (!%p2306_p12), 1, %s1631_s16   ;;  %p2307_p1 = scmp.ne.s32.totalorder (!%p2306_p12), %s2298_s11, 0 }
  0x7f   : > { %222 = sbr.rel (%p2306_p12) target bundleno = 728 (0x2d8), region = 32  ;;  %s1039_s3 = sshll.u32 (!%p2306_p12), %s1954_s9, 6 }
  0x80   : > { %s225_s5 = scalar_lea.sflag (!%p2306_p12), [#allocation4], %s1954_s9  ;;  %s1960_s12 = scalar_lea.vmem (!%p2306_p12), [#allocation3], %s1039_s3 }
  0x86   : > { %1602 = dma.done.wait (%p2307_p1), %s225_s5, 1024  }
  0x87   : > { %1604 = vsyncadd (%p2307_p1), %s225_s5, 4294966272  ;;  %s233_s27 = sand.u32 1, %s1741_s23   ;;  %s235_s10 = sand.u32 1, %s1619_s13  }
  0x88   : > { %s1040_s30 = sshll.u32 %s235_s10, 10  ;;  %s234_s15 = scalar_lea.sflag [#allocation7], %s233_s27 }
  0x89   : > { %s1970_s8 = scalar_lea.vmem [#allocation6], %s1040_s30  ;;  %p2308_p9 = scmp.ne.s32.totalorder %s2290_s28, 0 }
  0x8b   : > { %1606 = dma.done.wait (%p2308_p9), %s234_s15, 24576  }
  0x8c   : > { %1608 = vsyncadd (%p2308_p9), %s234_s15, 4294942720  ;;  %v282_v0 = vld [vmem:[%s1970_s8 + $0x8] sm:$0xff]  ;;  %v281_v2 = vld [vmem:[%s1970_s8] sm:$0xff]  ;;  %s1041_s23 = sshll.u32 %s235_s10, 9  ;;  %s2182_s11 = scalar_lea.vmem [#allocation9], %s1039_s3 }
  0x8d   : > { %v286_v1 = vld [vmem:[%s1970_s8 + $0x28] sm:$0xff]  ;;  %v285_v4 = vld [vmem:[%s1970_s8 + $0x20] sm:$0xff]  ;;  %v284_v23 = vld [vmem:[%s1970_s8 + $0x18] sm:$0xff]  ;;  %s2097_s28 = scalar_lea.vmem [#allocation8], %s1041_s23  ;;  %p1051_p8 = scmp.ne.s32.totalorder %s1639_s18, 0 }
  0x8e   : > { %v1065_v3 = vpack.c.bf16 %v286_v1, %v282_v0  ;;  %v290_v5 = vld [vmem:[%s1970_s8 + $0x48] sm:$0xff]  ;;  %v1067_v7 = vpack.c.bf16 %v285_v4, %v281_v2  ;;  %v289_v9 = vld [vmem:[%s1970_s8 + $0x40] sm:$0xff]  ;;  %v288_v24 = vld [vmem:[%s1970_s8 + $0x38] sm:$0xff] }
  0x8f   : > { %v294_v6 = vld [vmem:[%s1970_s8 + $0x68] sm:$0xff]  ;;  %v293_v10 = vld [vmem:[%s1970_s8 + $0x60] sm:$0xff]  ;;  %v1129_v27 = vpack.c.bf16 %v288_v24, %v284_v23  ;;  %v283_v28 = vld [vmem:[%s1970_s8 + $0x10] sm:$0xff] }
  0x90   : > { %v1069_v8 = vpack.c.bf16 %v294_v6, %v290_v5  ;;  %v298_v11 = vld [vmem:[%s1970_s8 + $0x88] sm:$0xff]  ;;  %1066 = vmatprep.subr.bf16.mxu0 %v1065_v3  ;;  %v1071_v13 = vpack.c.bf16 %v293_v10, %v289_v9  ;;  %v297_v15 = vld [vmem:[%s1970_s8 + $0x80] sm:$0xff]  ;;  %v287_v29 = vld [vmem:[%s1970_s8 + $0x30] sm:$0xff] }
  0x91   : > { %v302_v12 = vld [vmem:[%s1970_s8 + $0xa8] sm:$0xff]  ;;  %1068 = vmatpush1.bf16.msra.mxu0 %v1067_v7  ;;  %v301_v16 = vld [vmem:[%s1970_s8 + $0xa0] sm:$0xff]  ;;  %1130 = vmatprep.subr.bf16.mxu1 %v1129_v27  ;;  %v1131_v32 = vpack.c.bf16 %v287_v29, %v283_v28  ;;  %v292_v33 = vld [vmem:[%s1970_s8 + $0x58] sm:$0xff] }
  0x92   : > { %1070 = vmatprep.subr.bf16.mxu0 %v1069_v8  ;;  %v1073_v14 = vpack.c.bf16 %v302_v12, %v298_v11  ;;  %v306_v17 = vld [vmem:[%s1970_s8 + $0xc8] sm:$0xff]  ;;  %v1075_v19 = vpack.c.bf16 %v301_v16, %v297_v15  ;;  %v305_v20 = vld [vmem:[%s1970_s8 + $0xc0] sm:$0xff]  ;;  %v296_v34 = vld [vmem:[%s1970_s8 + $0x78] sm:$0xff] }
  0x93   : > { %v310_v18 = vld [vmem:[%s1970_s8 + $0xe8] sm:$0xff]  ;;  %v309_v22 = vld [vmem:[%s1970_s8 + $0xe0] sm:$0xff]  ;;  %v1133_v37 = vpack.c.bf16 %v296_v34, %v292_v33  ;;  %v291_v38 = vld [vmem:[%s1970_s8 + $0x50] sm:$0xff]  ;;  %1132 = vmatpush1.bf16.msra.mxu1 %v1131_v32 }
  0x94   : > { %v1077_v21 = vpack.c.bf16 %v310_v18, %v306_v17  ;;  %v314_v25 = vld [vmem:[%s1970_s8 + $0x108] sm:$0xff]  ;;  %v1079_v30 = vpack.c.bf16 %v309_v22, %v305_v20  ;;  %v313_v31 = vld [vmem:[%s1970_s8 + $0x100] sm:$0xff]  ;;  %v295_v39 = vld [vmem:[%s1970_s8 + $0x70] sm:$0xff] }
  0x95   : > { %1072 = vmatpush1.bf16.msra.mxu0 %v1071_v13  ;;  %v318_v26 = vld [vmem:[%s1970_s8 + $0x128] sm:$0xff]  ;;  %v317_v36 = vld [vmem:[%s1970_s8 + $0x120] sm:$0xff]  ;;  %v1135_v42 = vpack.c.bf16 %v295_v39, %v291_v38  ;;  %v300_v43 = vld [vmem:[%s1970_s8 + $0x98] sm:$0xff]  ;;  %1134 = vmatprep.subr.bf16.mxu1 %v1133_v37 }
  0x96   : > { %1074 = vmatprep.subr.bf16.mxu0 %v1073_v14  ;;  %v1081_v35 = vpack.c.bf16 %v318_v26, %v314_v25  ;;  %v322_v40 = vld [vmem:[%s1970_s8 + $0x148] sm:$0xff]  ;;  %v304_v44 = vld [vmem:[%s1970_s8 + $0xb8] sm:$0xff]  ;;  %v1083_v45 = vpack.c.bf16 %v317_v36, %v313_v31  ;;  %v321_v46 = vld [vmem:[%s1970_s8 + $0x140] sm:$0xff] }
  0x97   : > { %v326_v41 = vld [vmem:[%s1970_s8 + $0x168] sm:$0xff]  ;;  %v1137_v47 = vpack.c.bf16 %v304_v44, %v300_v43  ;;  %v299_v48 = vld [vmem:[%s1970_s8 + $0x90] sm:$0xff]  ;;  %v325_v51 = vld [vmem:[%s1970_s8 + $0x160] sm:$0xff]  ;;  %1136 = vmatpush1.bf16.msra.mxu1 %v1135_v42 }
  0x98   : > { %v303_v49 = vld [vmem:[%s1970_s8 + $0xb0] sm:$0xff]  ;;  %v1085_v50 = vpack.c.bf16 %v326_v41, %v322_v40  ;;  %v308_v52 = vld [vmem:[%s1970_s8 + $0xd8] sm:$0xff]  ;;  %v330_v54 = vld [vmem:[%s1970_s8 + $0x188] sm:$0xff]  ;;  %v1087_v60 = vpack.c.bf16 %v325_v51, %v321_v46 }
  0x99   : > { %1076 = vmatpush1.bf16.msra.mxu0 %v1075_v19  ;;  %v312_v53 = vld [vmem:[%s1970_s8 + $0xf8] sm:$0xff]  ;;  %v334_v55 = vld [vmem:[%s1970_s8 + $0x1a8] sm:$0xff]  ;;  %v1139_v56 = vpack.c.bf16 %v303_v49, %v299_v48  ;;  %1138 = vmatprep.subr.bf16.mxu1 %v1137_v47  ;;  %v307_v58 = vld [vmem:[%s1970_s8 + $0xd0] sm:$0xff] }
  0x9a   : > { %1078 = vmatprep.subr.bf16.mxu0 %v1077_v21  ;;  %v1141_v57 = vpack.c.bf16 %v312_v53, %v308_v52  ;;  %v311_v59 = vld [vmem:[%s1970_s8 + $0xf0] sm:$0xff]  ;;  %v316_v61 = vld [vmem:[%s1970_s8 + $0x118] sm:$0xff]  ;;  %v1089_v63 = vpack.c.bf16 %v334_v55, %v330_v54  ;;  %v329_v0 = vld [vmem:[%s1970_s8 + $0x180] sm:$0xff] }
  0x9b   : > { %v320_v62 = vld [vmem:[%s1970_s8 + $0x138] sm:$0xff]  ;;  %v333_v1 = vld [vmem:[%s1970_s8 + $0x1a0] sm:$0xff]  ;;  %v338_v2 = vld [vmem:[%s1970_s8 + $0x1c8] sm:$0xff]  ;;  %1140 = vmatpush1.bf16.msra.mxu1 %v1139_v56  ;;  %v1143_v4 = vpack.c.bf16 %v311_v59, %v307_v58 }
  0x9c   : > { %v342_v3 = vld [vmem:[%s1970_s8 + $0x1e8] sm:$0xff]  ;;  %1142 = vmatprep.subr.bf16.mxu1 %v1141_v57  ;;  %v1145_v5 = vpack.c.bf16 %v320_v62, %v316_v61  ;;  %v315_v6 = vld [vmem:[%s1970_s8 + $0x110] sm:$0xff]  ;;  %v1091_v8 = vpack.c.bf16 %v333_v1, %v329_v0  ;;  %v324_v9 = vld [vmem:[%s1970_s8 + $0x158] sm:$0xff] }
  0x9d   : > { %1080 = vmatpush1.bf16.msra.mxu0 %v1079_v30  ;;  %v319_v7 = vld [vmem:[%s1970_s8 + $0x130] sm:$0xff]  ;;  %v328_v10 = vld [vmem:[%s1970_s8 + $0x178] sm:$0xff]  ;;  %v1093_v11 = vpack.c.bf16 %v342_v3, %v338_v2  ;;  %v337_v12 = vld [vmem:[%s1970_s8 + $0x1c0] sm:$0xff] }
  0x9e   : > { %1082 = vmatprep.subr.bf16.mxu0 %v1081_v35  ;;  %v341_v13 = vld [vmem:[%s1970_s8 + $0x1e0] sm:$0xff]  ;;  %v346_v14 = vld [vmem:[%s1970_s8 + $0x208] sm:$0xff]  ;;  %v1147_v16 = vpack.c.bf16 %v319_v7, %v315_v6  ;;  %v1149_v17 = vpack.c.bf16 %v328_v10, %v324_v9  ;;  %v323_v18 = vld [vmem:[%s1970_s8 + $0x150] sm:$0xff] }
  0x9f   : > { %v350_v15 = vld [vmem:[%s1970_s8 + $0x228] sm:$0xff]  ;;  %1144 = vmatpush1.bf16.msra.mxu1 %v1143_v4  ;;  %v327_v19 = vld [vmem:[%s1970_s8 + $0x170] sm:$0xff]  ;;  %v1095_v20 = vpack.c.bf16 %v341_v13, %v337_v12  ;;  %v332_v21 = vld [vmem:[%s1970_s8 + $0x198] sm:$0xff] }
  0xa0   : > { %1146 = vmatprep.subr.bf16.mxu1 %v1145_v5  ;;  %v336_v22 = vld [vmem:[%s1970_s8 + $0x1b8] sm:$0xff]  ;;  %v1097_v23 = vpack.c.bf16 %v350_v15, %v346_v14  ;;  %v345_v24 = vld [vmem:[%s1970_s8 + $0x200] sm:$0xff]  ;;  %v354_v26 = vld [vmem:[%s1970_s8 + $0x248] sm:$0xff]  ;;  %v1151_v28 = vpack.c.bf16 %v327_v19, %v323_v18 }
  0xa1   : > { %1084 = vmatpush1.bf16.msra.mxu0 %v1083_v45  ;;  %v349_v25 = vld [vmem:[%s1970_s8 + $0x220] sm:$0xff]  ;;  %v358_v27 = vld [vmem:[%s1970_s8 + $0x268] sm:$0xff]  ;;  %v1153_v29 = vpack.c.bf16 %v336_v22, %v332_v21  ;;  %v331_v30 = vld [vmem:[%s1970_s8 + $0x190] sm:$0xff] }
  0xa2   : > { %1086 = vmatprep.subr.bf16.mxu0 %v1085_v50  ;;  %v335_v31 = vld [vmem:[%s1970_s8 + $0x1b0] sm:$0xff]  ;;  %v1099_v32 = vpack.c.bf16 %v349_v25, %v345_v24  ;;  %v340_v33 = vld [vmem:[%s1970_s8 + $0x1d8] sm:$0xff]  ;;  %v1101_v35 = vpack.c.bf16 %v358_v27, %v354_v26  ;;  %v353_v36 = vld [vmem:[%s1970_s8 + $0x240] sm:$0xff] }
  0xa3   : > { %1148 = vmatpush1.bf16.msra.mxu1 %v1147_v16  ;;  %v344_v34 = vld [vmem:[%s1970_s8 + $0x1f8] sm:$0xff]  ;;  %v357_v37 = vld [vmem:[%s1970_s8 + $0x260] sm:$0xff]  ;;  %v474_v38 = vld [vmem:[%s1960_s12 + $0x8] sm:$0xff]  ;;  %v1155_v41 = vpack.c.bf16 %v335_v31, %v331_v30 }
  0xa4   : > { %1150 = vmatprep.subr.bf16.mxu1 %v1149_v17  ;;  %v362_v39 = vld [vmem:[%s1970_s8 + $0x288] sm:$0xff]  ;;  %545 = vmatprep.mubr.f32.mxu0 %v474_v38  ;;  %v1157_v42 = vpack.c.bf16 %v344_v34, %v340_v33  ;;  %v339_v43 = vld [vmem:[%s1970_s8 + $0x1d0] sm:$0xff]  ;;  %v1103_v45 = vpack.c.bf16 %v357_v37, %v353_v36  ;;  %v348_v46 = vld [vmem:[%s1970_s8 + $0x218] sm:$0xff] }
  0xa5   : > { %1088 = vmatpush1.bf16.msra.mxu0 %v1087_v60  ;;  %v366_v40 = vld [vmem:[%s1970_s8 + $0x2a8] sm:$0xff]  ;;  %v343_v44 = vld [vmem:[%s1970_s8 + $0x1f0] sm:$0xff]  ;;  %634 = vmatprep.mubr.f32.mxu1 %v474_v38  ;;  %v352_v47 = vld [vmem:[%s1970_s8 + $0x238] sm:$0xff] }
  0xa6   : > { %1090 = vmatprep.subr.bf16.mxu0 %v1089_v63  ;;  %v1105_v48 = vpack.c.bf16 %v366_v40, %v362_v39  ;;  %v361_v49 = vld [vmem:[%s1970_s8 + $0x280] sm:$0xff]  ;;  %v370_v51 = vld [vmem:[%s1970_s8 + $0x2c8] sm:$0xff]  ;;  %v1159_v53 = vpack.c.bf16 %v343_v44, %v339_v43  ;;  %v1161_v54 = vpack.c.bf16 %v352_v47, %v348_v46  ;;  %v347_v55 = vld [vmem:[%s1970_s8 + $0x210] sm:$0xff] }
  0xa7   : > { %1152 = vmatpush1.bf16.msra.mxu1 %v1151_v28  ;;  %v365_v50 = vld [vmem:[%s1970_s8 + $0x2a0] sm:$0xff]  ;;  %v374_v52 = vld [vmem:[%s1970_s8 + $0x2e8] sm:$0xff]  ;;  %v351_v56 = vld [vmem:[%s1970_s8 + $0x230] sm:$0xff] }
  0xa8   : > { %1154 = vmatprep.subr.bf16.mxu1 %v1153_v29  ;;  %v1107_v57 = vpack.c.bf16 %v365_v50, %v361_v49  ;;  %v356_v58 = vld [vmem:[%s1970_s8 + $0x258] sm:$0xff]  ;;  %v1109_v60 = vpack.c.bf16 %v374_v52, %v370_v51  ;;  %v369_v61 = vld [vmem:[%s1970_s8 + $0x2c0] sm:$0xff]  ;;  %v378_v63 = vld [vmem:[%s1970_s8 + $0x308] sm:$0xff]  ;;  %v1163_v1 = vpack.c.bf16 %v351_v56, %v347_v55 }
  0xa9   : > { %1092 = vmatpush1.bf16.msra.mxu0 %v1091_v8  ;;  %v360_v59 = vld [vmem:[%s1970_s8 + $0x278] sm:$0xff]  ;;  %v373_v62 = vld [vmem:[%s1970_s8 + $0x2e0] sm:$0xff]  ;;  %v382_v0 = vld [vmem:[%s1970_s8 + $0x328] sm:$0xff] }
  0xaa   : > { %1094 = vmatprep.subr.bf16.mxu0 %v1093_v11  ;;  %v1165_v2 = vpack.c.bf16 %v360_v59, %v356_v58  ;;  %v355_v3 = vld [vmem:[%s1970_s8 + $0x250] sm:$0xff]  ;;  %v1111_v5 = vpack.c.bf16 %v373_v62, %v369_v61  ;;  %v364_v6 = vld [vmem:[%s1970_s8 + $0x298] sm:$0xff]  ;;  %v1113_v8 = vpack.c.bf16 %v382_v0, %v378_v63  ;;  %v377_v9 = vld [vmem:[%s1970_s8 + $0x300] sm:$0xff] }
  0xab   : > { %1156 = vmatpush1.bf16.msra.mxu1 %v1155_v41  ;;  %v359_v4 = vld [vmem:[%s1970_s8 + $0x270] sm:$0xff]  ;;  %v368_v7 = vld [vmem:[%s1970_s8 + $0x2b8] sm:$0xff]  ;;  %v381_v10 = vld [vmem:[%s1970_s8 + $0x320] sm:$0xff] }
  0xac   : > { %1158 = vmatprep.subr.bf16.mxu1 %v1157_v42  ;;  %v386_v11 = vld [vmem:[%s1970_s8 + $0x348] sm:$0xff]  ;;  %v1167_v13 = vpack.c.bf16 %v359_v4, %v355_v3  ;;  %v1169_v14 = vpack.c.bf16 %v368_v7, %v364_v6  ;;  %v363_v15 = vld [vmem:[%s1970_s8 + $0x290] sm:$0xff]  ;;  %v1115_v17 = vpack.c.bf16 %v381_v10, %v377_v9  ;;  %v372_v18 = vld [vmem:[%s1970_s8 + $0x2d8] sm:$0xff] }
  0xad   : > { %1096 = vmatpush1.bf16.msra.mxu0 %v1095_v20  ;;  %v390_v12 = vld [vmem:[%s1970_s8 + $0x368] sm:$0xff]  ;;  %v367_v16 = vld [vmem:[%s1970_s8 + $0x2b0] sm:$0xff]  ;;  %v376_v19 = vld [vmem:[%s1970_s8 + $0x2f8] sm:$0xff] }
  0xae   : > { %1098 = vmatprep.subr.bf16.mxu0 %v1097_v23  ;;  %v1117_v20 = vpack.c.bf16 %v390_v12, %v386_v11  ;;  %v385_v21 = vld [vmem:[%s1970_s8 + $0x340] sm:$0xff]  ;;  %v394_v23 = vld [vmem:[%s1970_s8 + $0x388] sm:$0xff]  ;;  %v1171_v25 = vpack.c.bf16 %v367_v16, %v363_v15  ;;  %v1173_v26 = vpack.c.bf16 %v376_v19, %v372_v18  ;;  %v371_v27 = vld [vmem:[%s1970_s8 + $0x2d0] sm:$0xff] }
  0xaf   : > { %1160 = vmatpush1.bf16.msra.mxu1 %v1159_v53  ;;  %v389_v22 = vld [vmem:[%s1970_s8 + $0x360] sm:$0xff]  ;;  %v398_v24 = vld [vmem:[%s1970_s8 + $0x3a8] sm:$0xff]  ;;  %v375_v28 = vld [vmem:[%s1970_s8 + $0x2f0] sm:$0xff] }
  0xb0   : > { %1162 = vmatprep.subr.bf16.mxu1 %v1161_v54  ;;  %v1119_v29 = vpack.c.bf16 %v389_v22, %v385_v21  ;;  %v380_v30 = vld [vmem:[%s1970_s8 + $0x318] sm:$0xff]  ;;  %v393_v33 = vld [vmem:[%s1970_s8 + $0x380] sm:$0xff]  ;;  %v406_v36 = vld [vmem:[%s1970_s8 + $0x3e8] sm:$0xff]  ;;  %v1175_v37 = vpack.c.bf16 %v375_v28, %v371_v27 }
  0xb1   : > { %1100 = vmatpush1.bf16.msra.mxu0 %v1099_v32  ;;  %v384_v31 = vld [vmem:[%s1970_s8 + $0x338] sm:$0xff]  ;;  %v1121_v32 = vpack.c.bf16 %v398_v24, %v394_v23  ;;  %v397_v34 = vld [vmem:[%s1970_s8 + $0x3a0] sm:$0xff]  ;;  %v379_v39 = vld [vmem:[%s1970_s8 + $0x310] sm:$0xff] }
  0xb2   : > { %1102 = vmatprep.subr.bf16.mxu0 %v1101_v35  ;;  %v402_v35 = vld [vmem:[%s1970_s8 + $0x3c8] sm:$0xff]  ;;  %v1177_v38 = vpack.c.bf16 %v384_v31, %v380_v30  ;;  %v383_v40 = vld [vmem:[%s1970_s8 + $0x330] sm:$0xff]  ;;  %v1123_v41 = vpack.c.bf16 %v397_v34, %v393_v33  ;;  %v388_v42 = vld [vmem:[%s1970_s8 + $0x358] sm:$0xff] }
  0xb3   : > { %1164 = vmatpush1.bf16.msra.mxu1 %v1163_v1  ;;  %v392_v43 = vld [vmem:[%s1970_s8 + $0x378] sm:$0xff]  ;;  %v1125_v44 = vpack.c.bf16 %v406_v36, %v402_v35  ;;  %v405_v46 = vld [vmem:[%s1970_s8 + $0x3e0] sm:$0xff]  ;;  %v1179_v47 = vpack.c.bf16 %v383_v40, %v379_v39  ;;  %v387_v51 = vld [vmem:[%s1970_s8 + $0x350] sm:$0xff] }
  0xb4   : > { %1166 = vmatprep.subr.bf16.mxu1 %v1165_v2  ;;  %v412_v49 = vld [vmem:[%s2097_s28 + $0x18] sm:$0xff]  ;;  %v1181_v50 = vpack.c.bf16 %v392_v43, %v388_v42  ;;  %v391_v52 = vld [vmem:[%s1970_s8 + $0x370] sm:$0xff]  ;;  %v473_v1 = vld [vmem:[%s1960_s12] sm:$0xff] }
  0xb5   : > { %1104 = vmatpush1.bf16.msra.mxu0 %v1103_v45  ;;  %v401_v45 = vld [vmem:[%s1970_s8 + $0x3c0] sm:$0xff]  ;;  %v396_v54 = vld [vmem:[%s1970_s8 + $0x398] sm:$0xff]  ;;  %v411_v58 = vld [vmem:[%s2097_s28 + $0x10] sm:$0xff]  ;;  %v1183_v59 = vpack.c.bf16 %v391_v52, %v387_v51 }
  0xb6   : > { %1106 = vmatprep.subr.bf16.mxu0 %v1105_v48  ;;  %v410_v48 = vld [vmem:[%s2097_s28 + $0x8] sm:$0xff]  ;;  %v1127_v53 = vpack.c.bf16 %v405_v46, %v401_v45  ;;  %v400_v55 = vld [vmem:[%s1970_s8 + $0x3b8] sm:$0xff]  ;;  %v395_v63 = vld [vmem:[%s1970_s8 + $0x390] sm:$0xff] }
  0xb7   : > { %1168 = vmatpush1.bf16.msra.mxu1 %v1167_v13  ;;  %v1193_v56 = vpack.c.bf16 %v412_v49, %v410_v48  ;;  %v416_v61 = vld [vmem:[%s2097_s28 + $0x38] sm:$0xff]  ;;  %v1185_v62 = vpack.c.bf16 %v400_v55, %v396_v54  ;;  %v399_v0 = vld [vmem:[%s1970_s8 + $0x3b0] sm:$0xff]  ;;  %v413_v7 = vld [vmem:[%s2097_s28 + $0x20] sm:$0xff] }
  0xb8   : > { %1170 = vmatprep.subr.bf16.mxu1 %v1169_v14  ;;  %v404_v2 = vld [vmem:[%s1970_s8 + $0x3d8] sm:$0xff]  ;;  %v1187_v9 = vpack.c.bf16 %v399_v0, %v395_v63  ;;  %v418_v10 = vld [vmem:[%s2097_s28 + $0x48] sm:$0xff]  ;;  %v403_v13 = vld [vmem:[%s1970_s8 + $0x3d0] sm:$0xff] }
  0xb9   : > { %1108 = vmatpush1.bf16.msra.mxu0 %v1107_v57  ;;  %v409_v57 = vld [vmem:[%s2097_s28] sm:$0xff]  ;;  %v408_v3 = vld [vmem:[%s1970_s8 + $0x3f8] sm:$0xff]  ;;  %v407_v14 = vld [vmem:[%s1970_s8 + $0x3f0] sm:$0xff] }
  0xba   : > { %1110 = vmatprep.subr.bf16.mxu0 %v1109_v60  ;;  %v414_v60 = vld [vmem:[%s2097_s28 + $0x28] sm:$0xff]  ;;  %v1195_v4 = vpack.c.bf16 %v411_v58, %v409_v57  ;;  %v420_v11 = vld [vmem:[%s2097_s28 + $0x58] sm:$0xff]  ;;  %v1189_v12 = vpack.c.bf16 %v408_v3, %v404_v2  ;;  %v475_v15 = vld [vmem:[%s1960_s12 + $0x10] sm:$0xff]  ;;  %v1191_v21 = vpack.c.bf16 %v407_v14, %v403_v13 }
  0xbb   : > { %1172 = vmatpush1.bf16.msra.mxu1 %v1171_v25  ;;  %v1197_v6 = vpack.c.bf16 %v416_v61, %v414_v60  ;;  %v1201_v18 = vpack.c.bf16 %v420_v11, %v418_v10  ;;  %v417_v19 = vld [vmem:[%s2097_s28 + $0x40] sm:$0xff]  ;;  %v422_v22 = vld [vmem:[%s2097_s28 + $0x68] sm:$0xff]  ;;  %v424_v23 = vld [vmem:[%s2097_s28 + $0x78] sm:$0xff] }
  0xbc   : > { %1174 = vmatprep.subr.bf16.mxu1 %v1173_v26  ;;  %v477_v24 = vld [vmem:[%s1960_s12 + $0x20] sm:$0xff]  ;;  %v480_v26 = vld [vmem:[%s1960_s12 + $0x38] sm:$0xff]  ;;  %v1205_v27 = vpack.c.bf16 %v424_v23, %v422_v22  ;;  %v426_v30 = vld [vmem:[%s2097_s28 + $0x88] sm:$0xff] }
  0xbd   : > { %1112 = vmatpush1.bf16.msra.mxu0 %v1111_v5  ;;  %v476_v5 = vld [vmem:[%s1960_s12 + $0x18] sm:$0xff]  ;;  %v421_v28 = vld [vmem:[%s2097_s28 + $0x60] sm:$0xff]  ;;  %v427_v36 = vld [vmem:[%s2097_s28 + $0x90] sm:$0xff] }
  0xbe   : > { %1114 = vmatprep.subr.bf16.mxu0 %v1113_v8  ;;  %v415_v8 = vld [vmem:[%s2097_s28 + $0x30] sm:$0xff]  ;;  %v428_v31 = vld [vmem:[%s2097_s28 + $0x98] sm:$0xff]  ;;  %v425_v35 = vld [vmem:[%s2097_s28 + $0x80] sm:$0xff] }
  0xbf   : > { %1176 = vmatpush1.bf16.msra.mxu1 %v1175_v37  ;;  %v1199_v16 = vpack.c.bf16 %v415_v8, %v413_v7  ;;  %v1209_v34 = vpack.c.bf16 %v428_v31, %v426_v30  ;;  %v430_v37 = vld [vmem:[%s2097_s28 + $0xa8] sm:$0xff]  ;;  %v1211_v39 = vpack.c.bf16 %v427_v36, %v425_v35  ;;  %v431_v42 = vld [vmem:[%s2097_s28 + $0xb0] sm:$0xff]  ;;  %v444_v57 = vld [vmem:[%s2097_s28 + $0x118] sm:$0xff] }
  0xc0   : > { %1178 = vmatprep.subr.bf16.mxu1 %v1177_v38  ;;  %v432_v38 = vld [vmem:[%s2097_s28 + $0xb8] sm:$0xff]  ;;  %v434_v43 = vld [vmem:[%s2097_s28 + $0xc8] sm:$0xff]  ;;  %v435_v48 = vld [vmem:[%s2097_s28 + $0xd0] sm:$0xff] }
  0xc1   : > { %1116 = vmatpush1.bf16.msra.mxu0 %v1115_v17  ;;  %v478_v17 = vld [vmem:[%s1960_s12 + $0x28] sm:$0xff]  ;;  %v1213_v40 = vpack.c.bf16 %v432_v38, %v430_v37  ;;  %v439_v54 = vld [vmem:[%s2097_s28 + $0xf0] sm:$0xff]  ;;  %v448_v63 = vld [vmem:[%s2097_s28 + $0x138] sm:$0xff] }
  0xc2   : > { %1118 = vmatprep.subr.bf16.mxu0 %v1117_v20  ;;  %v419_v20 = vld [vmem:[%s2097_s28 + $0x50] sm:$0xff]  ;;  %v438_v49 = vld [vmem:[%s2097_s28 + $0xe8] sm:$0xff]  ;;  %v449_v7 = vld [vmem:[%s2097_s28 + $0x140] sm:$0xff] }
  0xc3   : > { %1180 = vmatpush1.bf16.msra.mxu1 %v1179_v47  ;;  %v1203_v25 = vpack.c.bf16 %v419_v20, %v417_v19  ;;  %v433_v47 = vld [vmem:[%s2097_s28 + $0xc0] sm:$0xff]  ;;  %v443_v60 = vld [vmem:[%s2097_s28 + $0x110] sm:$0xff]  ;;  %v454_v10 = vld [vmem:[%s2097_s28 + $0x168] sm:$0xff] }
  0xc4   : > { %1182 = vmatprep.subr.bf16.mxu1 %v1181_v50  ;;  %v440_v50 = vld [vmem:[%s2097_s28 + $0xf8] sm:$0xff]  ;;  %v1219_v51 = vpack.c.bf16 %v435_v48, %v433_v47  ;;  %v447_v2 = vld [vmem:[%s2097_s28 + $0x130] sm:$0xff]  ;;  %v453_v13 = vld [vmem:[%s2097_s28 + $0x160] sm:$0xff] }
  0xc5   : > { %1120 = vmatpush1.bf16.msra.mxu0 %v1119_v29  ;;  %v423_v29 = vld [vmem:[%s2097_s28 + $0x70] sm:$0xff]  ;;  %v1221_v52 = vpack.c.bf16 %v440_v50, %v438_v49  ;;  %v456_v11 = vld [vmem:[%s2097_s28 + $0x178] sm:$0xff]  ;;  %v457_v19 = vld [vmem:[%s2097_s28 + $0x180] sm:$0xff] }
  0xc6   : > { %1122 = vmatprep.subr.bf16.mxu0 %v1121_v32  ;;  %v479_v32 = vld [vmem:[%s1960_s12 + $0x30] sm:$0xff]  ;;  %v1207_v33 = vpack.c.bf16 %v423_v29, %v421_v28  ;;  %v462_v22 = vld [vmem:[%s2097_s28 + $0x1a8] sm:$0xff]  ;;  %v464_v23 = vld [vmem:[%s2097_s28 + $0x1b8] sm:$0xff] }
  0xc7   : > { %1184 = vmatpush1.bf16.msra.mxu1 %v1183_v59  ;;  %v441_v59 = vld [vmem:[%s2097_s28 + $0x100] sm:$0xff]  ;;  %v451_v8 = vld [vmem:[%s2097_s28 + $0x150] sm:$0xff]  ;;  %v466_v28 = vld [vmem:[%s2097_s28 + $0x1c8] sm:$0xff] }
  0xc8   : > { %1186 = vmatprep.subr.bf16.mxu1 %v1185_v62  ;;  %v1227_v61 = vpack.c.bf16 %v443_v60, %v441_v59  ;;  %v446_v62 = vld [vmem:[%s2097_s28 + $0x128] sm:$0xff]  ;;  %v455_v14 = vld [vmem:[%s2097_s28 + $0x170] sm:$0xff]  ;;  %v468_v29 = vld [vmem:[%s2097_s28 + $0x1d8] sm:$0xff] }
  0xc9   : > { %1124 = vmatpush1.bf16.msra.mxu0 %v1123_v41  ;;  %v429_v41 = vld [vmem:[%s2097_s28 + $0xa0] sm:$0xff]  ;;  %v1229_v0 = vpack.c.bf16 %v448_v63, %v446_v62  ;;  %v459_v20 = vld [vmem:[%s2097_s28 + $0x190] sm:$0xff]  ;;  %v1249_v30 = vpack.c.bf16 %v468_v29, %v466_v28  ;;  %v472_v35 = vld [vmem:[%s2097_s28 + $0x1f8] sm:$0xff] }
  0xca   : > { %1126 = vmatprep.subr.bf16.mxu0 %v1125_v44  ;;  %v436_v44 = vld [vmem:[%s2097_s28 + $0xd8] sm:$0xff]  ;;  %v1215_v45 = vpack.c.bf16 %v431_v42, %v429_v41  ;;  %v465_v31 = vld [vmem:[%s2097_s28 + $0x1c0] sm:$0xff]  ;;  %v471_v38 = vld [vmem:[%s2097_s28 + $0x1f0] sm:$0xff] }
  0xcb   : > { %1188 = vmatpush1.bf16.msra.mxu1 %v1187_v9  ;;  %v1217_v46 = vpack.c.bf16 %v436_v44, %v434_v43  ;;  %v1235_v9 = vpack.c.bf16 %v451_v8, %v449_v7  ;;  %v469_v37 = vld [vmem:[%s2097_s28 + $0x1e0] sm:$0xff] }
  0xcc   : > { %1190 = vmatprep.subr.bf16.mxu1 %v1189_v12  ;;  %v1237_v12 = vpack.c.bf16 %v456_v11, %v454_v10 }
  0xcd   : > { %1128 = vmatpush1.bf16.msra.mxu0 %v1127_v53  ;;  %v437_v53 = vld [vmem:[%s2097_s28 + $0xe0] sm:$0xff] }
  0xce   : > { %1194 = vmatprep.subr.bf16.mxu0 %v1193_v56  ;;  %v1223_v55 = vpack.c.bf16 %v439_v54, %v437_v53 }
  0xcf   : > { %1192 = vmatpush1.bf16.msra.mxu1 %v1191_v21  ;;  %v1243_v21 = vpack.c.bf16 %v459_v20, %v457_v19 }
  0xd0   : > { %546 = vmatmul.mubr.f32.vlgmr.msra.gmra.mrb[0].mxu0 %v473_v1  ;;  %1257 = vmatprep.subr.bf16.mxu1 %v1193_v56  ;;  %v442_v56 = vld [vmem:[%s2097_s28 + $0x108] sm:$0xff] }
  0xd1   : > { %551 = vmatprep.mubr.f32.mxu0 %v476_v5  ;;  %1196 = vmatpush1.bf16.msra.mxu0 %v1195_v4  ;;  %v1225_v58 = vpack.c.bf16 %v444_v57, %v442_v56 }
  0xd2   : > { %1198 = vmatprep.subr.bf16.mxu0 %v1197_v6  ;;  %635 = vmatmul.mubr.f32.vlgmr.msra.gmra.mrb[0].mxu1 %v473_v1  ;;  %v445_v1 = vld [vmem:[%s2097_s28 + $0x120] sm:$0xff] }
  0xd3   : > { %640 = vmatprep.mubr.f32.mxu1 %v476_v5  ;;  %1273 = vmatpush1.bf16.msra.mxu1 %v1195_v4  ;;  %v1231_v3 = vpack.c.bf16 %v447_v2, %v445_v1  ;;  %v450_v4 = vld [vmem:[%s2097_s28 + $0x148] sm:$0xff]  ;;  %v452_v5 = vld [vmem:[%s2097_s28 + $0x158] sm:$0xff] }
  0xd4   : > { %552 = vmatmul.mubr.f32.gmra.mrb[2].mxu0 %v475_v15  ;;  %1258 = vmatprep.subr.bf16.mxu1 %v1197_v6  ;;  %v1233_v6 = vpack.c.bf16 %v452_v5, %v450_v4 }
  0xd5   : > { %557 = vmatprep.mubr.f32.mxu0 %v478_v17  ;;  %1200 = vmatpush1.bf16.msra.mxu0 %v1199_v16 }
  0xd6   : > { %1202 = vmatprep.subr.bf16.mxu0 %v1201_v18  ;;  %641 = vmatmul.mubr.f32.gmra.mrb[2].mxu1 %v475_v15  ;;  %v1239_v15 = vpack.c.bf16 %v455_v14, %v453_v13 }
  0xd7   : > { %646 = vmatprep.mubr.f32.mxu1 %v478_v17  ;;  %1274 = vmatpush1.bf16.msra.mxu1 %v1199_v16  ;;  %v458_v16 = vld [vmem:[%s2097_s28 + $0x188] sm:$0xff]  ;;  %v460_v17 = vld [vmem:[%s2097_s28 + $0x198] sm:$0xff] }
  0xd8   : > { %558 = vmatmul.mubr.f32.gmra.mrb[4].mxu0 %v477_v24  ;;  %1259 = vmatprep.subr.bf16.mxu1 %v1201_v18  ;;  %v1241_v18 = vpack.c.bf16 %v460_v17, %v458_v16 }
  0xd9   : > { %563 = vmatprep.mubr.f32.mxu0 %v480_v26  ;;  %1204 = vmatpush1.bf16.msra.mxu0 %v1203_v25 }
  0xda   : > { %1206 = vmatprep.subr.bf16.mxu0 %v1205_v27  ;;  %647 = vmatmul.mubr.f32.gmra.mrb[4].mxu1 %v477_v24  ;;  %v1245_v24 = vpack.c.bf16 %v464_v23, %v462_v22 }
  0xdb   : > { %652 = vmatprep.mubr.f32.mxu1 %v480_v26  ;;  %1275 = vmatpush1.bf16.msra.mxu1 %v1203_v25  ;;  %v461_v25 = vld [vmem:[%s2097_s28 + $0x1a0] sm:$0xff]  ;;  %v463_v26 = vld [vmem:[%s2097_s28 + $0x1b0] sm:$0xff] }
  0xdc   : > { %564 = vmatmul.mubr.f32.gmra.mrb[6].mxu0 %v479_v32  ;;  %1260 = vmatprep.subr.bf16.mxu1 %v1205_v27  ;;  %v1247_v27 = vpack.c.bf16 %v463_v26, %v461_v25 }
  0xdd   : > { %1208 = vmatpush1.bf16.msra.mxu0 %v1207_v33 }
  0xde   : > { %1210 = vmatprep.subr.bf16.mxu0 %v1209_v34  ;;  %653 = vmatmul.mubr.f32.gmra.mrb[6].mxu1 %v479_v32  ;;  %v467_v32 = vld [vmem:[%s2097_s28 + $0x1d0] sm:$0xff] }
  0xdf   : > { %1276 = vmatpush1.bf16.msra.mxu1 %v1207_v33  ;;  %v1251_v33 = vpack.c.bf16 %v467_v32, %v465_v31 }
  0xe0   : > { %1261 = vmatprep.subr.bf16.mxu1 %v1209_v34  ;;  %v470_v34 = vld [vmem:[%s2097_s28 + $0x1e8] sm:$0xff] }
  0xe1   : > { %1212 = vmatpush1.bf16.msra.mxu0 %v1211_v39  ;;  %v1253_v36 = vpack.c.bf16 %v472_v35, %v470_v34 }
  0xe2   : > { %1214 = vmatprep.subr.bf16.mxu0 %v1213_v40 }
  0xe3   : > { %1277 = vmatpush1.bf16.msra.mxu1 %v1211_v39  ;;  %v1255_v39 = vpack.c.bf16 %v471_v38, %v469_v37 }
  0xe4   : > { %1262 = vmatprep.subr.bf16.mxu1 %v1213_v40 }
  0xe5   : > { %1216 = vmatpush1.bf16.msra.mxu0 %v1215_v45 }
  0xe6   : > { %1218 = vmatprep.subr.bf16.mxu0 %v1217_v46 }
  0xe7   : > { %1278 = vmatpush1.bf16.msra.mxu1 %v1215_v45 }
  0xe8   : > { %1263 = vmatprep.subr.bf16.mxu1 %v1217_v46 }
  0xe9   : > { %1220 = vmatpush1.bf16.msra.mxu0 %v1219_v51 }
  0xea   : > { %1222 = vmatprep.subr.bf16.mxu0 %v1221_v52 }
  0xeb   : > { %1279 = vmatpush1.bf16.msra.mxu1 %v1219_v51 }
  0xec   : > { %1264 = vmatprep.subr.bf16.mxu1 %v1221_v52 }
  0xed   : > { %1224 = vmatpush1.bf16.msra.mxu0 %v1223_v55 }
  0xee   : > { %1226 = vmatprep.subr.bf16.mxu0 %v1225_v58 }
  0xef   : > { %1280 = vmatpush1.bf16.msra.mxu1 %v1223_v55 }
  0xf0   : > { %1265 = vmatprep.subr.bf16.mxu1 %v1225_v58 }
  0xf1   : > { %1228 = vmatpush1.bf16.msra.mxu0 %v1227_v61 }
  0xf2   : > { %1230 = vmatprep.subr.bf16.mxu0 %v1229_v0 }
  0xf3   : > { %1281 = vmatpush1.bf16.msra.mxu1 %v1227_v61 }
  0xf4   : > { %1266 = vmatprep.subr.bf16.mxu1 %v1229_v0 }
  0xf5   : > { %1232 = vmatpush1.bf16.msra.mxu0 %v1231_v3 }
  0xf6   : > { %1234 = vmatprep.subr.bf16.mxu0 %v1233_v6 }
  0xf7   : > { %1282 = vmatpush1.bf16.msra.mxu1 %v1231_v3 }
  0xf8   : > { %1267 = vmatprep.subr.bf16.mxu1 %v1233_v6 }
  0xf9   : > { %1236 = vmatpush1.bf16.msra.mxu0 %v1235_v9 }
  0xfa   : > { %1238 = vmatprep.subr.bf16.mxu0 %v1237_v12 }
  0xfb   : > { %1283 = vmatpush1.bf16.msra.mxu1 %v1235_v9 }
  0xfc   : > { %1268 = vmatprep.subr.bf16.mxu1 %v1237_v12 }
  0xfd   : > { %1240 = vmatpush1.bf16.msra.mxu0 %v1239_v15 }
  0xfe   : > { %1242 = vmatprep.subr.bf16.mxu0 %v1241_v18 }
  0xff   : > { %1284 = vmatpush1.bf16.msra.mxu1 %v1239_v15 }
 0x100   : > { %1269 = vmatprep.subr.bf16.mxu1 %v1241_v18 }
 0x101   : > { %1244 = vmatpush1.bf16.msra.mxu0 %v1243_v21 }
 0x102   : > { %1246 = vmatprep.subr.bf16.mxu0 %v1245_v24 }
 0x103   : > { %1285 = vmatpush1.bf16.msra.mxu1 %v1243_v21 }
 0x104   : > { %1270 = vmatprep.subr.bf16.mxu1 %v1245_v24 }
 0x105   : > { %1248 = vmatpush1.bf16.msra.mxu0 %v1247_v27 }
 0x106   : > { %1250 = vmatprep.subr.bf16.mxu0 %v1249_v30 }
 0x107   : > { %1286 = vmatpush1.bf16.msra.mxu1 %v1247_v27 }
 0x108   : > { %1271 = vmatprep.subr.bf16.mxu1 %v1249_v30 }
 0x109   : > { %1252 = vmatpush1.bf16.msra.mxu0 %v1251_v33 }
 0x10a   : > { %1254 = vmatprep.subr.bf16.mxu0 %v1253_v36 }
 0x10b   : > { %1287 = vmatpush1.bf16.msra.mxu1 %v1251_v33 }
 0x10c   : > { %1272 = vmatprep.subr.bf16.mxu1 %v1253_v36 }
 0x10d   : > { %1256 = vmatpush1.bf16.msra.mxu0 %v1255_v39 }
 0x10f   : > { %1288 = vmatpush1.bf16.msra.mxu1 %v1255_v39 }
 0x1a3   : > { %v547_v40 = vpop.f32.mrb[0].mxu0 }
 0x1a4   : > { %v1043_v41 = vmul.f32 -1.442695, %v547_v40  ;;  %v549_v42 = vpop.f32.mrb[1].mxu0 }
 0x1a5   : > { %v1044_v43 = vmul.f32 -1.442695, %v549_v42  ;;  %v636_v52 = vpop.f32.mrb[0].mxu1 }
 0x1a6   : > { %1407 = vpow2.f32 %v1043_v41  ;;  %v638_v53 = vpop.f32.mrb[1].mxu1 }
 0x1a7   : > { %1409 = vpow2.f32 %v1044_v43  ;;  %v553_v44 = vpop.f32.mrb[2].mxu0 }
 0x1a8   : > { %v1045_v45 = vmul.f32 -1.442695, %v553_v44  ;;  %v555_v46 = vpop.f32.mrb[3].mxu0 }
 0x1a9   : > { %v1046_v47 = vmul.f32 -1.442695, %v555_v46  ;;  %v642_v61 = vpop.f32.mrb[2].mxu1 }
 0x1aa   : > { %1411 = vpow2.f32 %v1045_v45  ;;  %v644_v63 = vpop.f32.mrb[3].mxu1 }
 0x1ab   : > { %1413 = vpow2.f32 %v1046_v47  ;;  %v559_v48 = vpop.f32.mrb[4].mxu0 }
 0x1ac   : > { %v1047_v49 = vmul.f32 -1.442695, %v559_v48  ;;  %v561_v50 = vpop.f32.mrb[5].mxu0 }
 0x1ad   : > { %v1048_v51 = vmul.f32 -1.442695, %v561_v50  ;;  %v648_v3 = vpop.f32.mrb[4].mxu1 }
 0x1ae   : > { %1415 = vpow2.f32 %v1047_v49  ;;  %v650_v5 = vpop.f32.mrb[5].mxu1 }
 0x1af   : > { %1417 = vpow2.f32 %v1048_v51  ;;  %v565_v54 = vpop.f32.mrb[6].mxu0 }
 0x1b0   : > { %v1408_v55 = vpop.eup %1407  ;;  %v1049_v56 = vmul.f32 -1.442695, %v565_v54  ;;  %v567_v57 = vpop.f32.mrb[7].mxu0 }
 0x1b1   : > { %v1410_v58 = vpop.eup %1409  ;;  %v683_v59 = vadd.f32 1.0, %v1408_v55  ;;  %v1050_v60 = vmul.f32 -1.442695, %v567_v57  ;;  %v654_v9 = vpop.f32.mrb[6].mxu1 }
 0x1b2   : > { %v684_v62 = vadd.f32 1.0, %v1410_v58  ;;  %1419 = vpow2.f32 %v1049_v56  ;;  %v656_v11 = vpop.f32.mrb[7].mxu1 }
 0x1b3   : > { %1421 = vrcp.f32 %v683_v59 }
 0x1b4   : > { %v1412_v0 = vpop.eup %1411  ;;  %1423 = vrcp.f32 %v684_v62 }
 0x1b5   : > { %v1414_v1 = vpop.eup %1413  ;;  %v685_v2 = vadd.f32 1.0, %v1412_v0  ;;  %1425 = vpow2.f32 %v1050_v60 }
 0x1b6   : > { %v686_v4 = vadd.f32 1.0, %v1414_v1 }
 0x1b7   : > { %1427 = vrcp.f32 %v685_v2 }
 0x1b8   : > { %v1416_v6 = vpop.eup %1415  ;;  %1429 = vrcp.f32 %v686_v4 }
 0x1b9   : > { %v1418_v7 = vpop.eup %1417  ;;  %v687_v8 = vadd.f32 1.0, %v1416_v6 }
 0x1ba   : > { %v688_v10 = vadd.f32 1.0, %v1418_v7 }
 0x1bb   : > { %1431 = vrcp.f32 %v687_v8 }
 0x1bc   : > { %v1420_v12 = vpop.eup %1419  ;;  %1433 = vrcp.f32 %v688_v10 }
 0x1bd   : > { %v1422_v13 = vpop.eup %1421  ;;  %v689_v14 = vadd.f32 1.0, %v1420_v12 }
 0x1be   : > { %v1424_v15 = vpop.eup %1423  ;;  %v707_v16 = vmul.f32 %v1422_v13, %v547_v40 }
 0x1bf   : > { %v1426_v17 = vpop.eup %1425  ;;  %v708_v18 = vmul.f32 %v1424_v15, %v549_v42  ;;  %1435 = vrcp.f32 %v689_v14 }
 0x1c0   : > { %v690_v19 = vadd.f32 1.0, %v1426_v17  ;;  %v715_v20 = vmul.f32 %v707_v16, %v636_v52 }
 0x1c1   : > { %v1428_v21 = vpop.eup %1427  ;;  %v716_v22 = vmul.f32 %v708_v18, %v638_v53 }
 0x1c2   : > { %v1430_v23 = vpop.eup %1429  ;;  %v709_v24 = vmul.f32 %v1428_v21, %v553_v44  ;;  %1437 = vrcp.f32 %v690_v19 }
 0x1c3   : > { %v710_v25 = vmul.f32 %v1430_v23, %v555_v46  ;;  %787 = vmatprep.mubr.f32.mxu0 %v716_v22 }
 0x1c4   : > { %v717_v26 = vmul.f32 %v709_v24, %v642_v61  ;;  %788 = vmatmul.mubr.f32.vlgmr.msra.gmra.mrb[8].mxu0 %v715_v20 }
 0x1c5   : > { %v1432_v27 = vpop.eup %1431  ;;  %v718_v28 = vmul.f32 %v710_v25, %v644_v63 }
 0x1c6   : > { %v1434_v29 = vpop.eup %1433  ;;  %v711_v30 = vmul.f32 %v1432_v27, %v559_v48 }
 0x1c7   : > { %v712_v31 = vmul.f32 %v1434_v29, %v561_v50  ;;  %793 = vmatprep.mubr.f32.mxu0 %v718_v28 }
 0x1c8   : > { %v719_v32 = vmul.f32 %v711_v30, %v648_v3  ;;  %794 = vmatmul.mubr.f32.gmra.mrb[10].mxu0 %v717_v26 }
 0x1c9   : > { %v1436_v33 = vpop.eup %1435  ;;  %v720_v34 = vmul.f32 %v712_v31, %v650_v5 }
 0x1ca   : > { %v713_v35 = vmul.f32 %v1436_v33, %v565_v54 }
 0x1cb   : > { %799 = vmatprep.mubr.f32.mxu1 %v720_v34 }
 0x1cc   : > { %v1438_v36 = vpop.eup %1437  ;;  %v721_v37 = vmul.f32 %v713_v35, %v654_v9  ;;  %800 = vmatmul.mubr.f32.vlgmr.msra.gmra.mrb[8].mxu1 %v719_v32 }
 0x1cd   : > { %v714_v38 = vmul.f32 %v1438_v36, %v567_v57 }
 0x1cf   : > { %v722_v39 = vmul.f32 %v714_v38, %v656_v11 }
 0x1d1   : > { %805 = vmatprep.mubr.f32.mxu1 %v722_v39 }
 0x1d2   : > { %806 = vmatmul.mubr.f32.gmra.mrb[10].mxu1 %v721_v37 }
 0x297   : > { %v789_v40 = vpop.f32.mrb[8].mxu0 }
 0x298   : > { %v791_v41 = vpop.f32.mrb[9].mxu0  ;;  %816 = vst [vmem:[#allocation2] sm:$0xff] (!%p1051_p8), %v789_v40 }
 0x299   : > { %817 = vst [vmem:[#allocation2 + $0x8] sm:$0xff] (!%p1051_p8), %v791_v41 }
 0x29b   : > { %v795_v42 = vpop.f32.mrb[10].mxu0 }
 0x29c   : > { %v797_v43 = vpop.f32.mrb[11].mxu0  ;;  %818 = vst [vmem:[#allocation2 + $0x10] sm:$0xff] (!%p1051_p8), %v795_v42 }
 0x29d   : > { %819 = vst [vmem:[#allocation2 + $0x18] sm:$0xff] (!%p1051_p8), %v797_v43 }
 0x29f   : > { %v801_v44 = vpop.f32.mrb[8].mxu1 }
 0x2a0   : > { %v803_v45 = vpop.f32.mrb[9].mxu1  ;;  %815 = sbr.rel (%p1051_p8) target bundleno = 680 (0x2a8), region = 48  ;;  %820 = vst [vmem:[#allocation2 + $0x20] sm:$0xff] (!%p1051_p8), %v801_v44 }
 0x2a1   : > { %821 = vst [vmem:[#allocation2 + $0x28] sm:$0xff] (!%p1051_p8), %v803_v45 }
 0x2a5   : > { %v807_v46 = vpop.f32.mrb[10].mxu1 }
 0x2a6   : > { %v809_v47 = vpop.f32.mrb[11].mxu1  ;;  %822 = vst [vmem:[#allocation2 + $0x30] sm:$0xff] (!%p1051_p8), %v807_v46 }
 0x2a7   : > { %823 = vst [vmem:[#allocation2 + $0x38] sm:$0xff] %v809_v47 }
 0x2a8 PF: > { %p824_p6 = scmp.gt.s32.totalorder %s1639_s18, 0  ;;  %p825_p4 = scmp.lt.s32.totalorder %s1639_s18, 1 }
 0x2aa   : > { %p826_p3 = pnand %p825_p4, %p824_p6 }
 0x2ab   : > { %v830_v48 = vld [vmem:[#allocation2] sm:$0xff] (!%p826_p3)  ;;  %v831_v49 = vld [vmem:[#allocation2 + $0x8] sm:$0xff] (!%p826_p3)  ;;  %v832_v50 = vld [vmem:[#allocation2 + $0x10] sm:$0xff] (!%p826_p3) }
 0x2ac   : > { %829 = sbr.rel (%p826_p3) target bundleno = 691 (0x2b3), region = 52  ;;  %v838_v51 = vadd.f32 (!%p826_p3), %v830_v48, %v789_v40  ;;  %v839_v52 = vadd.f32 (!%p826_p3), %v831_v49, %v791_v41  ;;  %v840_v53 = vadd.f32 (!%p826_p3), %v832_v50, %v795_v42  ;;  %v833_v54 = vld [vmem:[#allocation2 + $0x18] sm:$0xff] (!%p826_p3)  ;;  %v834_v55 = vld [vmem:[#allocation2 + $0x20] sm:$0xff] (!%p826_p3)  ;;  %v835_v56 = vld [vmem:[#allocation2 + $0x28] sm:$0xff] (!%p826_p3) }
 0x2ad   : > { %v841_v57 = vadd.f32 (!%p826_p3), %v833_v54, %v797_v43  ;;  %v842_v58 = vadd.f32 (!%p826_p3), %v834_v55, %v801_v44  ;;  %v843_v59 = vadd.f32 (!%p826_p3), %v835_v56, %v803_v45 }
 0x2ae   : > { %v836_v60 = vld [vmem:[#allocation2 + $0x30] sm:$0xff] (!%p826_p3)  ;;  %v837_v61 = vld [vmem:[#allocation2 + $0x38] sm:$0xff] (!%p826_p3)  ;;  %846 = vst [vmem:[#allocation2] sm:$0xff] (!%p826_p3), %v838_v51  ;;  %847 = vst [vmem:[#allocation2 + $0x8] sm:$0xff] (!%p826_p3), %v839_v52 }
 0x2af   : > { %848 = vst [vmem:[#allocation2 + $0x10] sm:$0xff] (!%p826_p3), %v840_v53  ;;  %v844_v62 = vadd.f32 (!%p826_p3), %v836_v60, %v807_v46  ;;  %v845_v63 = vadd.f32 (!%p826_p3), %v837_v61, %v809_v47  ;;  %849 = vst [vmem:[#allocation2 + $0x18] sm:$0xff] (!%p826_p3), %v841_v57 }
 0x2b0   : > { %850 = vst [vmem:[#allocation2 + $0x20] sm:$0xff] (!%p826_p3), %v842_v58  ;;  %851 = vst [vmem:[#allocation2 + $0x28] sm:$0xff] (!%p826_p3), %v843_v59 }
 0x2b1   : > { %852 = vst [vmem:[#allocation2 + $0x30] sm:$0xff] (!%p826_p3), %v844_v62  ;;  %853 = vst [vmem:[#allocation2 + $0x38] sm:$0xff] (!%p826_p3), %v845_v63 }
 0x2b3 PF: > { %p1052_p2 = scmp.ne.s32.totalorder %s1639_s18, 1 }
 0x2b5   : > { %857 = sbr.rel (%p1052_p2) target bundleno = 700 (0x2bc), region = 56  ;;  %v858_v0 = vld [vmem:[#allocation2] sm:$0xff] (!%p1052_p2)  ;;  %v859_v1 = vld [vmem:[#allocation2 + $0x8] sm:$0xff] (!%p1052_p2) }
 0x2b6   : > { %v860_v2 = vld [vmem:[#allocation2 + $0x10] sm:$0xff] (!%p1052_p2)  ;;  %v866_v3 = vadd.f32 (!%p1052_p2), %v858_v0, %v789_v40  ;;  %v867_v4 = vadd.f32 (!%p1052_p2), %v859_v1, %v791_v41  ;;  %v861_v6 = vld [vmem:[#allocation2 + $0x18] sm:$0xff] (!%p1052_p2) }
 0x2b7   : > { %v868_v5 = vadd.f32 (!%p1052_p2), %v860_v2, %v795_v42  ;;  %v862_v7 = vld [vmem:[#allocation2 + $0x20] sm:$0xff] (!%p1052_p2)  ;;  %v863_v8 = vld [vmem:[#allocation2 + $0x28] sm:$0xff] (!%p1052_p2)  ;;  %v869_v9 = vadd.f32 (!%p1052_p2), %v861_v6, %v797_v43 }
 0x2b8   : > { %v870_v10 = vadd.f32 (!%p1052_p2), %v862_v7, %v801_v44  ;;  %v871_v11 = vadd.f32 (!%p1052_p2), %v863_v8, %v803_v45  ;;  %v864_v12 = vld [vmem:[#allocation2 + $0x30] sm:$0xff] (!%p1052_p2)  ;;  %v865_v13 = vld [vmem:[#allocation2 + $0x38] sm:$0xff] (!%p1052_p2)  ;;  %874 = vst [vmem:[%s2182_s11] sm:$0xff] (!%p1052_p2), %v866_v3  ;;  %875 = vst [vmem:[%s2182_s11 + $0x8] sm:$0xff] (!%p1052_p2), %v867_v4 }
 0x2b9   : > { %876 = vst [vmem:[%s2182_s11 + $0x10] sm:$0xff] (!%p1052_p2), %v868_v5  ;;  %v872_v14 = vadd.f32 (!%p1052_p2), %v864_v12, %v807_v46  ;;  %v873_v15 = vadd.f32 (!%p1052_p2), %v865_v13, %v809_v47  ;;  %877 = vst [vmem:[%s2182_s11 + $0x18] sm:$0xff] (!%p1052_p2), %v869_v9 }
 0x2ba   : > { %878 = vst [vmem:[%s2182_s11 + $0x20] sm:$0xff] (!%p1052_p2), %v870_v10  ;;  %879 = vst [vmem:[%s2182_s11 + $0x28] sm:$0xff] (!%p1052_p2), %v871_v11 }
 0x2bb   : > { %880 = vst [vmem:[%s2182_s11 + $0x30] sm:$0xff] (!%p1052_p2), %v872_v14  ;;  %881 = vst [vmem:[%s2182_s11 + $0x38] sm:$0xff] (!%p1052_p2), %v873_v15 }
 0x2bc PF: > { %s1064_s18 = sshll.u32 %s1643_s19, 10  ;;  %s2309_s21 = sld [smem:[#allocation20_spill]] }
 0x2bd   : > { %s897_s6 = sshll.u32 %s2182_s11, 4  ;;  %s883_s26 = scalar_lea.sflag [#allocation5], %s1954_s9  ;;  %s2203_s6 = int_to_ptr.vmem [resolvable:$true] %s897_s6 }
 0x2be   : > { %s1529_s3 = scalar_lea.vmem %s2203_s6, 1024  ;;  %p2311_p7 = scmp.ne.s32.totalorder %s2300_s25, 0 }
 0x2bf   : > { %p1530_p11 = scmp.ne.s32.totalorder %s2203_s6, %s1529_s3  ;;  %s1664_s5 = smov [#allocation9]  }
 0x2c0   : > { %s1533_s12 = sshll.u32 %s1664_s5, 4  ;;  %s1534_s12 = int_to_ptr.vmem [resolvable:$false] %s1533_s12 }
 0x2c1   : > { %p1531_p5 = pnand %p1530_p11, %p2311_p7  ;;  %s1535_s19 = scalar_lea.vmem %s1534_s12, 2048 }
 0x2c2   : > { %s2310_s24 = smov %s2309_s21  ;;  %s2200_s4 = scalar_lea.hbm %s2309_s21, %s1064_s18 }
 0x2c3   : > { %p1532_p0 = pneg %p1531_p5  ;;  %p1536_p13 = scmp.lt.s32.totalorder %s2203_s6, %s1534_s12 }
 0x2c4   : > { %p1537_p10 = scmp.lt.s32.totalorder %s1535_s19, %s1529_s3 }
 0x2c6   : > { %p1538_p12 = por %p1537_p10, %p1536_p13 }
 0x2c8   : > { %p1539_p1 = pnand %p1538_p12, %p1532_p0 }
 0x2ca   : > { %1542 = shalt.err (!%p1539_p1)
}
 0x2cb   : > { %s1543_s27 = scalar_lea.hbm %s2200_s4, 1024  ;;  %s1547_s15 = scalar_lea.hbm %s2310_s24, 2048 }
 0x2cc   : > { %p1544_p9 = scmp.ne.s32.totalorder %s2200_s4, %s1543_s27  ;;  %p1548_p4 = scmp.lt.u32.totalorder %s2200_s4, %s2310_s24 }
 0x2cd   : > { %p1549_p3 = scmp.lt.u32.totalorder %s1547_s15, %s1543_s27  ;;  %p1551_p11 = scmp.lt.u32.totalorder %s1543_s27, %s2200_s4 }
 0x2ce   : > { %p1545_p8 = pnand %p1544_p9, %p2311_p7 }
 0x2cf   : > { %p1550_p2 = por %p1549_p3, %p1548_p4 }
 0x2d0   : > { %p1546_p6 = pneg %p1545_p8 }
 0x2d1   : > { %p1552_p5 = por %p1551_p11, %p1550_p2 }
 0x2d3   : > { %p1553_p0 = pnand %p1552_p5, %p1546_p6 }
 0x2d5   : > { %1556 = shalt.err (!%p1553_p0)
}
 0x2d6   : > { %s1665_s28 = smov 256   ;;  %s1666_s11 = smov 16  }
 0x2d7   : > { %1295 = dma.vmem_to_hbm [thread:$0]  (%p2311_p7), %s2203_s6, 1024, %s2200_s4, %s883_s26, %s1665_s28, %s1665_s28, %s1666_s11  }
 0x2d8 PF: > { %s2312_s18 = sld [smem:[#allocation14_spill]]  ;;  %p1312_p13 = scmp.ge.s32.totalorder %s1655_s22, 2 }
 0x2d9   : > { %p2313_p10 = scmp.ne.s32.totalorder %s2301_s7, 0 }
 0x2db   : > { %p1308_p12 = pnand %p1312_p13, %p2313_p10 }
 0x2de   : > { %s912_s29 = sand.u32 1, %s2312_s18  }
 0x2df   : > { %s913_s14 = scalar_lea.sflag [#allocation5], %s912_s29 }
 0x2e0   : > { %1610 = dma.done.wait (!%p1308_p12), %s913_s14, 1024  }
 0x2e1   : > { %1612 = vsyncadd (!%p1308_p12), %s913_s14, 4294966272  ;;  %s22_s22 = sadd.s32 1, %s1655_s22   ;;  %s2314_s21 = sld [smem:[#allocation13_spill]] }
 0x2e2   : > { %p19_p1 = scmp.ge.s32.totalorder %s22_s22, 6   ;;  %s2315_s14 = sld [smem:[#allocation17_spill]] }
 0x2e3   : > { %s2316_s19 = sld [smem:[#allocation15_spill]]  ;;  %s2317_s25 = sld [smem:[#allocation16_spill]] }
 0x2e4   : > { %s2318_s9 = sld [smem:[#allocation18_spill]]  ;;  %s2319_s12 = smov %s1619_s13 }
 0x2e5   : > { %s2321_s15 = smov %s1631_s16  ;;  %s2322_s16 = smov %s1635_s17 }
 0x2e6   : > { %s2323_s17 = smov %s1864_s1  ;;  %s2324_s18 = smov %s1647_s20 }
 0x2e7   : > { %s2320_s13 = smov %s2314_s21  ;;  %21 = sbr.rel (!%p19_p1) target bundleno = 14 (0xe), region = 113 }
 0x2e9   : > { %s2325_s20 = smov %s2317_s25 }
 0x2ea   : > { %s2326_s21 = smov %s2318_s9 }
 0x2ee   :  { %918 = vsyncpa [#allocation4], 1 }
 0x2ef   :  { %920 = vsyncpa [#allocation4 + $0x1], 1 }
 0x2f0   :  { %921 = vsyncpa [#allocation7], 1 }
 0x2f1   :  { %923 = vsyncpa [#allocation7 + $0x1], 1 }
 0x2f2   :  { %924 = vsyncpa [#allocation5], 1 }
 0x2f3   :  { %926 = vsyncpa [#allocation5 + $0x1], 1 }

</bundles_post_ra>
